<compile_context>
chip_gen: v7x
topology: tpu7x:2x2x1
jax: 0.10.0
libtpu: 0.0.40
codegen_flags: <defaults>
</compile_context>

<pallas_src>
import functools

import jax
import jax.numpy as jnp
from jax.experimental import pallas as pl
from jax.experimental.pallas import tpu as pltpu


# ---------------------------------------------------------------------------
# helpers
# ---------------------------------------------------------------------------
def _round_up(x: int, m: int) -> int:
    return (x + m - 1) // m * m


def _vmem_limit(resident_bytes: int, tile_bytes: int) -> int:
    # single-buffered residents + double-buffered pipelined tiles + headroom,
    # clamped to v7x's 64 MiB physical VMEM.
    need = resident_bytes + 2 * tile_bytes + (4 << 20)
    return int(min(max(need, 16 << 20), 64 << 20))


def rotary_tables(seq_len: int, dim_head: int):
    inv_freq = 1.0 / (10000.0 ** (jnp.arange(0, dim_head, 2, dtype=jnp.float32) / dim_head))
    freqs = jnp.arange(seq_len, dtype=jnp.float32)[:, None] * inv_freq[None, :]
    pos = jnp.concatenate([freqs, freqs], axis=-1)          # (S, dim_head)
    return jnp.cos(pos), jnp.sin(pos)


_VMEM_SPEC = pl.BlockSpec(memory_space=pltpu.MemorySpace.VMEM)


# ---------------------------------------------------------------------------
# Kernel 1: fused ParallelTransformerBlock + residual   (grid over batch)
# ---------------------------------------------------------------------------
def _block_kernel(x_ref, cos_ref, sin_ref, g_ref,
                  wq_ref, wk_ref, wv_ref, wffx_ref, wffg_ref, wo_ref, wffo_ref,
                  o_ref, *, heads, dim_head, scale):
    x = x_ref[0].astype(jnp.float32)                         # (S, D)
    # LayerNorm (learnable gamma, beta buffer == 0)
    mu = jnp.mean(x, axis=-1, keepdims=True)
    xc = x - mu
    var = jnp.mean(xc * xc, axis=-1, keepdims=True)
    xn = xc * jax.lax.rsqrt(var + 1e-5) * g_ref[...].astype(jnp.float32)

    dt = wq_ref.dtype                                        # matmul operand dtype
    xnc = xn.astype(dt)
    q = jnp.dot(xnc, wq_ref[...], preferred_element_type=jnp.float32)    # (S, h*dh)
    k = jnp.dot(xnc, wk_ref[...], preferred_element_type=jnp.float32)    # (S, dh)
    v = jnp.dot(xnc, wv_ref[...], preferred_element_type=jnp.float32)    # (S, dh)
    ff_x = jnp.dot(xnc, wffx_ref[...], preferred_element_type=jnp.float32)
    ff_g = jnp.dot(xnc, wffg_ref[...], preferred_element_type=jnp.float32)

    cos = cos_ref[...].astype(jnp.float32)                   # (S, dh)
    sin = sin_ref[...].astype(jnp.float32)
    half = dim_head // 2

    def rope(t):                                             # (S, dh)
        rot = jnp.concatenate([-t[:, half:], t[:, :half]], axis=-1)
        return t * cos + rot * sin

    k_r = rope(k)
    sl = x.shape[0]
    row = jax.lax.broadcasted_iota(jnp.int32, (sl, sl), 0)
    col = jax.lax.broadcasted_iota(jnp.int32, (sl, sl), 1)
    neg_max = -jnp.finfo(jnp.float32).max

    attn_out = None
    for h in range(heads):
        qh = rope(q[:, h * dim_head:(h + 1) * dim_head]) * scale
        # q @ k^T without materializing a transpose (NT dot_general)
        sim = jax.lax.dot_general(qh, k_r, (((1,), (1,)), ((), ())),
                                  preferred_element_type=jnp.float32)     # (S, S)
        sim = jnp.where(col > row, neg_max, sim)                          # causal mask
        sim = sim - jnp.max(sim, axis=-1, keepdims=True)
        p = jnp.exp(sim)
        attn = p / jnp.sum(p, axis=-1, keepdims=True)
        out_h = jnp.dot(attn, v, preferred_element_type=jnp.float32)      # (S, dh)
        part = jnp.dot(out_h.astype(dt),
                       wo_ref[h * dim_head:(h + 1) * dim_head, :],
                       preferred_element_type=jnp.float32)                # (S, D)
        attn_out = part if attn_out is None else attn_out + part

    swiglu = jax.nn.silu(ff_g) * ff_x
    ff_out = jnp.dot(swiglu.astype(dt), wffo_ref[...],
                     preferred_element_type=jnp.float32)                  # (S, D)

    o_ref[0] = (attn_out + ff_out + x).astype(o_ref.dtype)                # + residual


def parallel_block(x, cos, sin, layer, *, heads, dim_head):
    B, S, D = x.shape
    attn_inner = heads * dim_head
    ff_inner = layer["wffx"].shape[1]
    residents = (cos, sin, layer["ln_g"], layer["wq"], layer["wk"], layer["wv"],
                 layer["wffx"], layer["wffg"], layer["wo"], layer["wffo"])
    resident_bytes = sum(int(a.size) * a.dtype.itemsize for a in residents)
    tile_bytes = 2 * S * D * x.dtype.itemsize + S * (2 * ff_inner + 2 * attn_inner) * 4

    flops = (2 * B * S * D * (attn_inner + 2 * dim_head + 2 * ff_inner)   # projections
             + 4 * B * heads * S * S * dim_head                            # qk^T + attn@v
             + 2 * B * S * attn_inner * D + 2 * B * S * ff_inner * D)      # out projections
    transc = B * heads * S * S + B * S * ff_inner
    bytes_acc = 2 * B * S * D * x.dtype.itemsize + resident_bytes

    kern = functools.partial(_block_kernel, heads=heads, dim_head=dim_head,
                             scale=dim_head ** -0.5)
    return pl.pallas_call(
        kern,
        out_shape=jax.ShapeDtypeStruct((B, S, D), x.dtype),
        grid_spec=pltpu.PrefetchScalarGridSpec(
            num_scalar_prefetch=0,
            grid=(B,),
            in_specs=[pl.BlockSpec((1, S, D), lambda b: (b, 0, 0))]
                     + [_VMEM_SPEC] * len(residents),
            out_specs=pl.BlockSpec((1, S, D), lambda b: (b, 0, 0)),
        ),
        compiler_params=pltpu.CompilerParams(
            dimension_semantics=("parallel",),
            vmem_limit_bytes=_vmem_limit(resident_bytes, tile_bytes),
        ),
        cost_estimate=pl.CostEstimate(flops=int(flops), transcendentals=int(transc),
                                      bytes_accessed=int(bytes_acc)),
    )(x, *residents)


# ---------------------------------------------------------------------------
# Row-tiled kernels: FeedForward(+residual) and logits head
# ---------------------------------------------------------------------------
def _ffn_kernel(x_ref, g_ref, b_ref, w1_ref, b1_ref, w2_ref, b2_ref, o_ref):
    x = x_ref[...].astype(jnp.float32)
    mu = jnp.mean(x, axis=-1, keepdims=True)
    xc = x - mu
    var = jnp.mean(xc * xc, axis=-1, keepdims=True)
    xn = (xc * jax.lax.rsqrt(var + 1e-5) * g_ref[...].astype(jnp.float32)
          + b_ref[...].astype(jnp.float32))
    dt = w1_ref.dtype
    h = (jnp.dot(xn.astype(dt), w1_ref[...], preferred_element_type=jnp.float32)
         + b1_ref[...].astype(jnp.float32))
    # TODO(synk): torch nn.GELU() is exact (erf); tanh approximation used here.
    h = jax.nn.gelu(h, approximate=True)
    y = (jnp.dot(h.astype(dt), w2_ref[...], preferred_element_type=jnp.float32)
         + b2_ref[...].astype(jnp.float32))
    o_ref[...] = (y + x).astype(o_ref.dtype)                 # + residual (Dropout = eval identity)


def _head_kernel(x_ref, g_ref, w_ref, b_ref, o_ref, *, eps, rms_scale):
    x = x_ref[...].astype(jnp.float32)
    norm = jnp.sqrt(jnp.sum(x * x, axis=-1, keepdims=True)) * rms_scale
    xn = x / jnp.maximum(norm, eps) * g_ref[...].astype(jnp.float32)
    dt = w_ref.dtype
    o_ref[...] = (jnp.dot(xn.astype(dt), w_ref[...], preferred_element_type=jnp.float32)
                  + b_ref[...].astype(jnp.float32)).astype(o_ref.dtype)


def _rowwise_call(kernel, x, residents, out_dim, out_dtype, *, tm,
                  flops_per_row, transc_per_row, extra_f32_cols=0):
    B, S, D = x.shape
    M = B * S
    x2 = x.reshape(M, D)
    Mp = _round_up(M, 8)                  # sublane alignment only (<= 7 pad rows)
    if Mp != M:
        x2 = jnp.pad(x2, ((0, Mp - M), (0, 0)))
    tmr = max(8, min(_round_up(tm, 8), Mp))
    grid = (pl.cdiv(Mp, tmr),)            # ragged last tile handled by Pallas masking

    resident_bytes = sum(int(a.size) * a.dtype.itemsize for a in residents)
    tile_bytes = tmr * (D * x2.dtype.itemsize
                        + out_dim * jnp.dtype(out_dtype).itemsize
                        + extra_f32_cols * 4)

    out = pl.pallas_call(
        kernel,
        out_shape=jax.ShapeDtypeStruct((Mp, out_dim), out_dtype),
        grid_spec=pltpu.PrefetchScalarGridSpec(
            num_scalar_prefetch=0,
            grid=grid,
            in_specs=[pl.BlockSpec((tmr, D), lambda i: (i, 0))]
                     + [_VMEM_SPEC] * len(residents),
            out_specs=pl.BlockSpec((tmr, out_dim), lambda i: (i, 0)),
        ),
        compiler_params=pltpu.CompilerParams(
            dimension_semantics=("parallel",),
            vmem_limit_bytes=_vmem_limit(resident_bytes, tile_bytes),
        ),
        cost_estimate=pl.CostEstimate(
            flops=int(flops_per_row * M),
            transcendentals=int(transc_per_row * M),
            bytes_accessed=int(M * (D * x2.dtype.itemsize
                                    + out_dim * jnp.dtype(out_dtype).itemsize)
                               + resident_bytes),
        ),
    )(x2, *residents)

    if Mp != M:
        out = out[:M]
    return out.reshape(B, S, out_dim)


def ffn_residual(x, layer, *, tm=1024):
    D = x.shape[-1]
    H = layer["w1"].shape[1]
    residents = (layer["ffn_g"], layer["ffn_b"], layer["w1"], layer["b1"],
                 layer["w2"], layer["b2"])
    return _rowwise_call(_ffn_kernel, x, residents, D, x.dtype, tm=tm,
                         flops_per_row=4 * D * H, transc_per_row=H,
                         extra_f32_cols=H)


def logits_head(x, head, *, tm=1024):
    D = x.shape[-1]
    V = head["w"].shape[1]
    kern = functools.partial(_head_kernel, eps=1e-8, rms_scale=D ** -0.5)
    residents = (head["rms_g"], head["w"], head["b"])
    return _rowwise_call(kern, x, residents, V, x.dtype, tm=tm,
                         flops_per_row=2 * D * V, transc_per_row=0)


# ---------------------------------------------------------------------------
# Full SimpleTransformer forward
# ---------------------------------------------------------------------------
def simple_transformer_forward(params, tokens, *, heads, dim_head):
    # TODO(synk): embedding row-gather stays in XLA (jnp.take); a dense-BlockSpec
    # Pallas gather has no efficient equivalent at this granularity.
    x = jnp.take(params["emb"], tokens, axis=0)
    _, S, _ = x.shape
    cos, sin = rotary_tables(S, dim_head)
    for layer in params["layers"]:
        x = parallel_block(x, cos, sin, layer, heads=heads, dim_head=dim_head)  # block(x)+x
        x = ffn_residual(x, layer)                                              # ff(x)+x
    return logits_head(x, params["head"])


# ---------------------------------------------------------------------------
# Parameter init (weights stored pre-cast -> no per-call casts on the hot path)
# ---------------------------------------------------------------------------
def init_params(key, *, dim, depth, num_tokens, dim_head, heads, ff_mult,
                param_dtype=jnp.float32):
    attn_inner = dim_head * heads
    ff_inner = dim * ff_mult

    def rnd(k, shape, scale):
        return (jax.random.normal(k, shape, jnp.float32) * scale).astype(param_dtype)

    keys = jax.random.split(key, 2 + depth)
    params = {"emb": rnd(keys[0], (num_tokens, dim), 1.0), "layers": []}
    s_in = dim ** -0.5
    for li in range(depth):
        lk = jax.random.split(keys[2 + li], 11)
        params["layers"].append(dict(
            ln_g=jnp.ones((1, dim), param_dtype),
            # fused_attn_ff_proj split once at init into q / k / v / ff_x / ff_gate
            wq=rnd(lk[0], (dim, attn_inner), s_in),
            wk=rnd(lk[1], (dim, dim_head), s_in),
            wv=rnd(lk[2], (dim, dim_head), s_in),
            wffx=rnd(lk[3], (dim, ff_inner), s_in),
            wffg=rnd(lk[4], (dim, ff_inner), s_in),
            wo=rnd(lk[5], (attn_inner, dim), attn_inner ** -0.5),
            wffo=rnd(lk[6], (ff_inner, dim), ff_inner ** -0.5),
            ffn_g=jnp.ones((1, dim), param_dtype),
            ffn_b=jnp.zeros((1, dim), param_dtype),
            w1=rnd(lk[7], (dim, dim), s_in),
            b1=rnd(lk[8], (1, dim), 0.02),
            w2=rnd(lk[9], (dim, dim), s_in),
            b2=rnd(lk[10], (1, dim), 0.02),
        ))
    params["head"] = dict(
        rms_g=jnp.ones((1, dim), param_dtype),
        w=rnd(keys[1], (dim, num_tokens), s_in),
        b=jnp.zeros((1, num_tokens), param_dtype),
    )
    return params


# ---------------------------------------------------------------------------
# Pure-JAX f32 reference (mirrors the PyTorch module math)
# ---------------------------------------------------------------------------
def reference_forward(params, tokens, *, heads, dim_head):
    hi = jax.lax.Precision.HIGHEST
    f32 = jnp.float32
    x = jnp.take(params["emb"].astype(f32), tokens, axis=0)
    B, S, D = x.shape
    cos, sin = rotary_tables(S, dim_head)

    def rope(t):
        d = t.shape[-1] // 2
        rot = jnp.concatenate([-t[..., d:], t[..., :d]], axis=-1)
        return t * cos + rot * sin

    def ln(v, g, b=None):
        mu = v.mean(-1, keepdims=True)
        var = ((v - mu) ** 2).mean(-1, keepdims=True)
        out = (v - mu) * jax.lax.rsqrt(var + 1e-5) * g
        return out if b is None else out + b

    for layer in params["layers"]:
        L = {k: v.astype(f32) for k, v in layer.items()}
        xn = ln(x, L["ln_g"].reshape(1, 1, D))
        q = jnp.einsum("bnd,de->bne", xn, L["wq"], precision=hi)
        k = jnp.einsum("bnd,de->bne", xn, L["wk"], precision=hi)
        v = jnp.einsum("bnd,de->bne", xn, L["wv"], precision=hi)
        ffx = jnp.einsum("bnd,de->bne", xn, L["wffx"], precision=hi)
        ffg = jnp.einsum("bnd,de->bne", xn, L["wffg"], precision=hi)
        q = q.reshape(B, S, heads, dim_head).transpose(0, 2, 1, 3)
        q = rope(q) * dim_head ** -0.5
        k = rope(k)
        sim = jnp.einsum("bhid,bjd->bhij", q, k, precision=hi)
        ii = jnp.arange(S)[:, None]
        jj = jnp.arange(S)[None, :]
        sim = jnp.where(jj > ii, -jnp.finfo(f32).max, sim)
        attn = jax.nn.softmax(sim, axis=-1)
        o = jnp.einsum("bhij,bjd->bhid", attn, v, precision=hi)
        o = o.transpose(0, 2, 1, 3).reshape(B, S, heads * dim_head)
        attn_out = jnp.einsum("bnd,de->bne", o, L["wo"], precision=hi)
        ff_out = jnp.einsum("bnd,de->bne", jax.nn.silu(ffg) * ffx, L["wffo"], precision=hi)
        x = attn_out + ff_out + x
        xn = ln(x, L["ffn_g"].reshape(1, 1, D), L["ffn_b"].reshape(1, 1, D))
        h = jax.nn.gelu(jnp.einsum("bnd,de->bne", xn, L["w1"], precision=hi)
                        + L["b1"].reshape(1, 1, -1), approximate=True)
        x = jnp.einsum("bnd,de->bne", h, L["w2"], precision=hi) + L["b2"].reshape(1, 1, D) + x

    H = {k: v.astype(f32) for k, v in params["head"].items()}
    norm = jnp.sqrt(jnp.sum(x * x, axis=-1, keepdims=True)) * D ** -0.5
    xn = x / jnp.maximum(norm, 1e-8) * H["rms_g"].reshape(1, 1, D)
    return jnp.einsum("bnd,dv->bnv", xn, H["w"], precision=hi) + H["b"].reshape(1, 1, -1)


# ---------------------------------------------------------------------------
if __name__ == "__main__":
    dim, depth, num_tokens = 128, 2, 256
    dim_head, heads, ff_mult = 32, 4, 4
    B, S = 2, 8

    key = jax.random.PRNGKey(0)
    kp, kt = jax.random.split(key)
    params = init_params(kp, dim=dim, depth=depth, num_tokens=num_tokens,
                         dim_head=dim_head, heads=heads, ff_mult=ff_mult,
                         param_dtype=jnp.float32)
    tokens = jax.random.randint(kt, (B, S), 0, num_tokens)

    # f32 path
    logits = jax.block_until_ready(
        simple_transformer_forward(params, tokens, heads=heads, dim_head=dim_head))
    ref = reference_forward(params, tokens, heads=heads, dim_head=dim_head)
    assert logits.shape == (B, S, num_tokens), logits.shape
    err = float(jnp.max(jnp.abs(logits - ref)))
    assert jnp.allclose(logits, ref, atol=1e-1, rtol=1e-1), err

    # bf16 weights + bf16 activation stream (pre-cast once, f32 accumulation in-kernel)
    params_bf16 = jax.tree_util.tree_map(
        lambda a: a.astype(jnp.bfloat16) if a.dtype == jnp.float32 else a, params)
    logits_bf16 = jax.block_until_ready(
        simple_transformer_forward(params_bf16, tokens, heads=heads, dim_head=dim_head))
    assert logits_bf16.dtype == jnp.bfloat16
    err_bf16 = float(jnp.max(jnp.abs(logits_bf16.astype(jnp.float32) - ref)))
    assert jnp.all(jnp.isfinite(logits_bf16.astype(jnp.float32))) and err_bf16 < 0.5, err_bf16

    print("KERNEL_OK")
</pallas_src>

<mosaic_0001>
module attributes {stable_mosaic.version = 11 : i64} {
  func.func @_block_kernel(%arg0: i32, %arg1: memref<1x8x128xf32, #tpu.memory_space<vmem>>, %arg2: memref<8x32xf32, #tpu.memory_space<vmem>>, %arg3: memref<8x32xf32, #tpu.memory_space<vmem>>, %arg4: memref<1x128xf32, #tpu.memory_space<vmem>>, %arg5: memref<128x128xf32, #tpu.memory_space<vmem>>, %arg6: memref<128x32xf32, #tpu.memory_space<vmem>>, %arg7: memref<128x32xf32, #tpu.memory_space<vmem>>, %arg8: memref<128x512xf32, #tpu.memory_space<vmem>>, %arg9: memref<128x512xf32, #tpu.memory_space<vmem>>, %arg10: memref<128x128xf32, #tpu.memory_space<vmem>>, %arg11: memref<512x128xf32, #tpu.memory_space<vmem>>, %arg12: memref<1x8x128xf32, #tpu.memory_space<vmem>>) attributes {dimension_semantics = [#tpu.dimension_semantics<parallel>], iteration_bounds = array<i64: 2>, scalar_prefetch = 0 : i64, scratch_operands = 0 : i64, tpu.core_type = #tpu.core_type<tc>, window_params = [{transform_indices = @transform_0, window_bounds = array<i64: 1, 8, 128>}, {pipeline_mode = #tpu.pipeline_mode<synchronous>, transform_indices = @transform_1, window_bounds = array<i64: 8, 32>}, {pipeline_mode = #tpu.pipeline_mode<synchronous>, transform_indices = @transform_2, window_bounds = array<i64: 8, 32>}, {pipeline_mode = #tpu.pipeline_mode<synchronous>, transform_indices = @transform_3, window_bounds = array<i64: 1, 128>}, {pipeline_mode = #tpu.pipeline_mode<synchronous>, transform_indices = @transform_4, window_bounds = array<i64: 128, 128>}, {pipeline_mode = #tpu.pipeline_mode<synchronous>, transform_indices = @transform_5, window_bounds = array<i64: 128, 32>}, {pipeline_mode = #tpu.pipeline_mode<synchronous>, transform_indices = @transform_6, window_bounds = array<i64: 128, 32>}, {pipeline_mode = #tpu.pipeline_mode<synchronous>, transform_indices = @transform_7, window_bounds = array<i64: 128, 512>}, {pipeline_mode = #tpu.pipeline_mode<synchronous>, transform_indices = @transform_8, window_bounds = array<i64: 128, 512>}, {pipeline_mode = #tpu.pipeline_mode<synchronous>, transform_indices = @transform_9, window_bounds = array<i64: 128, 128>}, {pipeline_mode = #tpu.pipeline_mode<synchronous>, transform_indices = @transform_10, window_bounds = array<i64: 512, 128>}, {transform_indices = @transform_11, window_bounds = array<i64: 1, 8, 128>}]} {
    %c0 = arith.constant 0 : index
    %c0_0 = arith.constant 0 : index
    %c0_1 = arith.constant 0 : index
    %0 = vector.load %arg1[%c0, %c0_0, %c0_1] : memref<1x8x128xf32, #tpu.memory_space<vmem>>, vector<1x8x128xf32>
    %1 = vector.shape_cast %0 : vector<1x8x128xf32> to vector<8x128xf32>
    %cst = arith.constant dense<0.000000e+00> : vector<8xf32>
    %2 = vector.multi_reduction <add>, %1, %cst [1] : vector<8x128xf32> to vector<8xf32>
    %3 = vector.shape_cast %2 : vector<8xf32> to vector<8x1xf32>
    %cst_2 = arith.constant 1.280000e+02 : f32
    %4 = vector.broadcast %cst_2 : f32 to vector<8x1xf32>
    %5 = arith.divf %3, %4 : vector<8x1xf32>
    %6 = vector.broadcast %5 : vector<8x1xf32> to vector<8x128xf32>
    %7 = arith.subf %1, %6 : vector<8x128xf32>
    %8 = arith.mulf %7, %7 : vector<8x128xf32>
    %cst_3 = arith.constant dense<0.000000e+00> : vector<8xf32>
    %9 = vector.multi_reduction <add>, %8, %cst_3 [1] : vector<8x128xf32> to vector<8xf32>
    %10 = vector.shape_cast %9 : vector<8xf32> to vector<8x1xf32>
    %cst_4 = arith.constant 1.280000e+02 : f32
    %11 = vector.broadcast %cst_4 : f32 to vector<8x1xf32>
    %12 = arith.divf %10, %11 : vector<8x1xf32>
    %cst_5 = arith.constant 9.99999974E-6 : f32
    %13 = vector.broadcast %cst_5 : f32 to vector<8x1xf32>
    %14 = arith.addf %12, %13 : vector<8x1xf32>
    %15 = math.rsqrt %14 : vector<8x1xf32>
    %16 = vector.broadcast %15 : vector<8x1xf32> to vector<8x128xf32>
    %17 = arith.mulf %7, %16 : vector<8x128xf32>
    %c0_6 = arith.constant 0 : index
    %c0_7 = arith.constant 0 : index
    %18 = vector.load %arg4[%c0_6, %c0_7] : memref<1x128xf32, #tpu.memory_space<vmem>>, vector<1x128xf32>
    %19 = vector.broadcast %18 : vector<1x128xf32> to vector<8x128xf32>
    %20 = arith.mulf %17, %19 : vector<8x128xf32>
    %c0_8 = arith.constant 0 : index
    %c0_9 = arith.constant 0 : index
    %21 = vector.load %arg5[%c0_8, %c0_9] : memref<128x128xf32, #tpu.memory_space<vmem>>, vector<128x128xf32>
    %cst_10 = arith.constant dense<0.000000e+00> : vector<8x128xf32>
    %22 = tpu.matmul %20, %21, %cst_10 {dimension_numbers = #tpu.dot_dimension_numbers<[1], [0], [0], [1], [0, 0, 1, 1], [], []>} : vector<8x128xf32>, vector<128x128xf32>, vector<8x128xf32> -> vector<8x128xf32>
    %c0_11 = arith.constant 0 : index
    %c0_12 = arith.constant 0 : index
    %23 = vector.load %arg6[%c0_11, %c0_12] : memref<128x32xf32, #tpu.memory_space<vmem>>, vector<128x32xf32>
    %cst_13 = arith.constant dense<0.000000e+00> : vector<8x32xf32>
    %24 = tpu.matmul %20, %23, %cst_13 {dimension_numbers = #tpu.dot_dimension_numbers<[1], [0], [0], [1], [0, 0, 1, 1], [], []>} : vector<8x128xf32>, vector<128x32xf32>, vector<8x32xf32> -> vector<8x32xf32>
    %c0_14 = arith.constant 0 : index
    %c0_15 = arith.constant 0 : index
    %25 = vector.load %arg7[%c0_14, %c0_15] : memref<128x32xf32, #tpu.memory_space<vmem>>, vector<128x32xf32>
    %cst_16 = arith.constant dense<0.000000e+00> : vector<8x32xf32>
    %26 = tpu.matmul %20, %25, %cst_16 {dimension_numbers = #tpu.dot_dimension_numbers<[1], [0], [0], [1], [0, 0, 1, 1], [], []>} : vector<8x128xf32>, vector<128x32xf32>, vector<8x32xf32> -> vector<8x32xf32>
    %c0_17 = arith.constant 0 : index
    %c0_18 = arith.constant 0 : index
    %27 = vector.load %arg8[%c0_17, %c0_18] : memref<128x512xf32, #tpu.memory_space<vmem>>, vector<128x512xf32>
    %cst_19 = arith.constant dense<0.000000e+00> : vector<8x512xf32>
    %28 = tpu.matmul %20, %27, %cst_19 {dimension_numbers = #tpu.dot_dimension_numbers<[1], [0], [0], [1], [0, 0, 1, 1], [], []>} : vector<8x128xf32>, vector<128x512xf32>, vector<8x512xf32> -> vector<8x512xf32>
    %c0_20 = arith.constant 0 : index
    %c0_21 = arith.constant 0 : index
    %29 = vector.load %arg9[%c0_20, %c0_21] : memref<128x512xf32, #tpu.memory_space<vmem>>, vector<128x512xf32>
    %cst_22 = arith.constant dense<0.000000e+00> : vector<8x512xf32>
    %30 = tpu.matmul %20, %29, %cst_22 {dimension_numbers = #tpu.dot_dimension_numbers<[1], [0], [0], [1], [0, 0, 1, 1], [], []>} : vector<8x128xf32>, vector<128x512xf32>, vector<8x512xf32> -> vector<8x512xf32>
    %c0_23 = arith.constant 0 : index
    %c0_24 = arith.constant 0 : index
    %31 = vector.load %arg2[%c0_23, %c0_24] : memref<8x32xf32, #tpu.memory_space<vmem>>, vector<8x32xf32>
    %c0_25 = arith.constant 0 : index
    %c0_26 = arith.constant 0 : index
    %32 = vector.load %arg3[%c0_25, %c0_26] : memref<8x32xf32, #tpu.memory_space<vmem>>, vector<8x32xf32>
    %33 = vector.extract_strided_slice %24 {offsets = [0, 16], sizes = [8, 16], strides = [1, 1]} : vector<8x32xf32> to vector<8x16xf32>
    %cst_27 = arith.constant 0.000000e+00 : f32
    %34 = vector.broadcast %cst_27 : f32 to vector<8x16xf32>
    %35 = arith.subf %34, %33 : vector<8x16xf32>
    %36 = vector.extract_strided_slice %24 {offsets = [0, 0], sizes = [8, 16], strides = [1, 1]} : vector<8x32xf32> to vector<8x16xf32>
    %37 = tpu.concatenate %35, %36 in 1 : vector<8x16xf32>, vector<8x16xf32> -> vector<8x32xf32>
    %38 = arith.mulf %24, %31 : vector<8x32xf32>
    %39 = arith.mulf %37, %32 : vector<8x32xf32>
    %40 = arith.addf %38, %39 : vector<8x32xf32>
    %41 = tpu.iota {dimensions = array<i32: 0>} : vector<8x8xi32>
    %42 = tpu.iota {dimensions = array<i32: 1>} : vector<8x8xi32>
    %43 = vector.extract_strided_slice %22 {offsets = [0, 0], sizes = [8, 32], strides = [1, 1]} : vector<8x128xf32> to vector<8x32xf32>
    %44 = vector.extract_strided_slice %43 {offsets = [0, 16], sizes = [8, 16], strides = [1, 1]} : vector<8x32xf32> to vector<8x16xf32>
    %cst_28 = arith.constant 0.000000e+00 : f32
    %45 = vector.broadcast %cst_28 : f32 to vector<8x16xf32>
    %46 = arith.subf %45, %44 : vector<8x16xf32>
    %47 = vector.extract_strided_slice %43 {offsets = [0, 0], sizes = [8, 16], strides = [1, 1]} : vector<8x32xf32> to vector<8x16xf32>
    %48 = tpu.concatenate %46, %47 in 1 : vector<8x16xf32>, vector<8x16xf32> -> vector<8x32xf32>
    %49 = arith.mulf %43, %31 : vector<8x32xf32>
    %50 = arith.mulf %48, %32 : vector<8x32xf32>
    %51 = arith.addf %49, %50 : vector<8x32xf32>
    %cst_29 = arith.constant 0.176776692 : f32
    %52 = vector.broadcast %cst_29 : f32 to vector<8x32xf32>
    %53 = arith.mulf %51, %52 : vector<8x32xf32>
    %cst_30 = arith.constant dense<0.000000e+00> : vector<8x8xf32>
    %54 = tpu.matmul %53, %40, %cst_30 {dimension_numbers = #tpu.dot_dimension_numbers<[1], [1], [0], [0], [0, 0, 1, 0], [], []>} : vector<8x32xf32>, vector<8x32xf32>, vector<8x8xf32> -> vector<8x8xf32>
    %55 = arith.cmpi sgt, %42, %41 : vector<8x8xi32>
    %cst_31 = arith.constant -3.40282347E+38 : f32
    %56 = vector.broadcast %cst_31 : f32 to vector<8x8xf32>
    %57 = arith.select %55, %56, %54 : vector<8x8xi1>, vector<8x8xf32>
    %cst_32 = arith.constant dense<0xFF800000> : vector<8xf32>
    %58 = vector.multi_reduction <maximumf>, %57, %cst_32 [1] : vector<8x8xf32> to vector<8xf32>
    %59 = vector.shape_cast %58 : vector<8xf32> to vector<8x1xf32>
    %60 = vector.broadcast %59 : vector<8x1xf32> to vector<8x8xf32>
    %61 = arith.subf %57, %60 : vector<8x8xf32>
    %62 = math.exp %61 : vector<8x8xf32>
    %cst_33 = arith.constant dense<0.000000e+00> : vector<8xf32>
    %63 = vector.multi_reduction <add>, %62, %cst_33 [1] : vector<8x8xf32> to vector<8xf32>
    %64 = vector.shape_cast %63 : vector<8xf32> to vector<8x1xf32>
    %65 = vector.broadcast %64 : vector<8x1xf32> to vector<8x8xf32>
    %66 = arith.divf %62, %65 : vector<8x8xf32>
    %cst_34 = arith.constant dense<0.000000e+00> : vector<8x32xf32>
    %67 = tpu.matmul %66, %26, %cst_34 {dimension_numbers = #tpu.dot_dimension_numbers<[1], [0], [0], [1], [0, 0, 1, 1], [], []>} : vector<8x8xf32>, vector<8x32xf32>, vector<8x32xf32> -> vector<8x32xf32>
    %c0_35 = arith.constant 0 : index
    %c0_36 = arith.constant 0 : index
    %68 = vector.load %arg10[%c0_35, %c0_36] : memref<128x128xf32, #tpu.memory_space<vmem>>, vector<32x128xf32>
    %cst_37 = arith.constant dense<0.000000e+00> : vector<8x128xf32>
    %69 = tpu.matmul %67, %68, %cst_37 {dimension_numbers = #tpu.dot_dimension_numbers<[1], [0], [0], [1], [0, 0, 1, 1], [], []>} : vector<8x32xf32>, vector<32x128xf32>, vector<8x128xf32> -> vector<8x128xf32>
    %70 = vector.extract_strided_slice %22 {offsets = [0, 32], sizes = [8, 32], strides = [1, 1]} : vector<8x128xf32> to vector<8x32xf32>
    %71 = vector.extract_strided_slice %70 {offsets = [0, 16], sizes = [8, 16], strides = [1, 1]} : vector<8x32xf32> to vector<8x16xf32>
    %cst_38 = arith.constant 0.000000e+00 : f32
    %72 = vector.broadcast %cst_38 : f32 to vector<8x16xf32>
    %73 = arith.subf %72, %71 : vector<8x16xf32>
    %74 = vector.extract_strided_slice %70 {offsets = [0, 0], sizes = [8, 16], strides = [1, 1]} : vector<8x32xf32> to vector<8x16xf32>
    %75 = tpu.concatenate %73, %74 in 1 : vector<8x16xf32>, vector<8x16xf32> -> vector<8x32xf32>
    %76 = arith.mulf %70, %31 : vector<8x32xf32>
    %77 = arith.mulf %75, %32 : vector<8x32xf32>
    %78 = arith.addf %76, %77 : vector<8x32xf32>
    %cst_39 = arith.constant 0.176776692 : f32
    %79 = vector.broadcast %cst_39 : f32 to vector<8x32xf32>
    %80 = arith.mulf %78, %79 : vector<8x32xf32>
    %cst_40 = arith.constant dense<0.000000e+00> : vector<8x8xf32>
    %81 = tpu.matmul %80, %40, %cst_40 {dimension_numbers = #tpu.dot_dimension_numbers<[1], [1], [0], [0], [0, 0, 1, 0], [], []>} : vector<8x32xf32>, vector<8x32xf32>, vector<8x8xf32> -> vector<8x8xf32>
    %82 = arith.cmpi sgt, %42, %41 : vector<8x8xi32>
    %cst_41 = arith.constant -3.40282347E+38 : f32
    %83 = vector.broadcast %cst_41 : f32 to vector<8x8xf32>
    %84 = arith.select %82, %83, %81 : vector<8x8xi1>, vector<8x8xf32>
    %cst_42 = arith.constant dense<0xFF800000> : vector<8xf32>
    %85 = vector.multi_reduction <maximumf>, %84, %cst_42 [1] : vector<8x8xf32> to vector<8xf32>
    %86 = vector.shape_cast %85 : vector<8xf32> to vector<8x1xf32>
    %87 = vector.broadcast %86 : vector<8x1xf32> to vector<8x8xf32>
    %88 = arith.subf %84, %87 : vector<8x8xf32>
    %89 = math.exp %88 : vector<8x8xf32>
    %cst_43 = arith.constant dense<0.000000e+00> : vector<8xf32>
    %90 = vector.multi_reduction <add>, %89, %cst_43 [1] : vector<8x8xf32> to vector<8xf32>
    %91 = vector.shape_cast %90 : vector<8xf32> to vector<8x1xf32>
    %92 = vector.broadcast %91 : vector<8x1xf32> to vector<8x8xf32>
    %93 = arith.divf %89, %92 : vector<8x8xf32>
    %cst_44 = arith.constant dense<0.000000e+00> : vector<8x32xf32>
    %94 = tpu.matmul %93, %26, %cst_44 {dimension_numbers = #tpu.dot_dimension_numbers<[1], [0], [0], [1], [0, 0, 1, 1], [], []>} : vector<8x8xf32>, vector<8x32xf32>, vector<8x32xf32> -> vector<8x32xf32>
    %c32 = arith.constant 32 : index
    %c0_45 = arith.constant 0 : index
    %95 = vector.load %arg10[%c32, %c0_45] : memref<128x128xf32, #tpu.memory_space<vmem>>, vector<32x128xf32>
    %cst_46 = arith.constant dense<0.000000e+00> : vector<8x128xf32>
    %96 = tpu.matmul %94, %95, %cst_46 {dimension_numbers = #tpu.dot_dimension_numbers<[1], [0], [0], [1], [0, 0, 1, 1], [], []>} : vector<8x32xf32>, vector<32x128xf32>, vector<8x128xf32> -> vector<8x128xf32>
    %97 = arith.addf %69, %96 : vector<8x128xf32>
    %98 = vector.extract_strided_slice %22 {offsets = [0, 64], sizes = [8, 32], strides = [1, 1]} : vector<8x128xf32> to vector<8x32xf32>
    %99 = vector.extract_strided_slice %98 {offsets = [0, 16], sizes = [8, 16], strides = [1, 1]} : vector<8x32xf32> to vector<8x16xf32>
    %cst_47 = arith.constant 0.000000e+00 : f32
    %100 = vector.broadcast %cst_47 : f32 to vector<8x16xf32>
    %101 = arith.subf %100, %99 : vector<8x16xf32>
    %102 = vector.extract_strided_slice %98 {offsets = [0, 0], sizes = [8, 16], strides = [1, 1]} : vector<8x32xf32> to vector<8x16xf32>
    %103 = tpu.concatenate %101, %102 in 1 : vector<8x16xf32>, vector<8x16xf32> -> vector<8x32xf32>
    %104 = arith.mulf %98, %31 : vector<8x32xf32>
    %105 = arith.mulf %103, %32 : vector<8x32xf32>
    %106 = arith.addf %104, %105 : vector<8x32xf32>
    %cst_48 = arith.constant 0.176776692 : f32
    %107 = vector.broadcast %cst_48 : f32 to vector<8x32xf32>
    %108 = arith.mulf %106, %107 : vector<8x32xf32>
    %cst_49 = arith.constant dense<0.000000e+00> : vector<8x8xf32>
    %109 = tpu.matmul %108, %40, %cst_49 {dimension_numbers = #tpu.dot_dimension_numbers<[1], [1], [0], [0], [0, 0, 1, 0], [], []>} : vector<8x32xf32>, vector<8x32xf32>, vector<8x8xf32> -> vector<8x8xf32>
    %110 = arith.cmpi sgt, %42, %41 : vector<8x8xi32>
    %cst_50 = arith.constant -3.40282347E+38 : f32
    %111 = vector.broadcast %cst_50 : f32 to vector<8x8xf32>
    %112 = arith.select %110, %111, %109 : vector<8x8xi1>, vector<8x8xf32>
    %cst_51 = arith.constant dense<0xFF800000> : vector<8xf32>
    %113 = vector.multi_reduction <maximumf>, %112, %cst_51 [1] : vector<8x8xf32> to vector<8xf32>
    %114 = vector.shape_cast %113 : vector<8xf32> to vector<8x1xf32>
    %115 = vector.broadcast %114 : vector<8x1xf32> to vector<8x8xf32>
    %116 = arith.subf %112, %115 : vector<8x8xf32>
    %117 = math.exp %116 : vector<8x8xf32>
    %cst_52 = arith.constant dense<0.000000e+00> : vector<8xf32>
    %118 = vector.multi_reduction <add>, %117, %cst_52 [1] : vector<8x8xf32> to vector<8xf32>
    %119 = vector.shape_cast %118 : vector<8xf32> to vector<8x1xf32>
    %120 = vector.broadcast %119 : vector<8x1xf32> to vector<8x8xf32>
    %121 = arith.divf %117, %120 : vector<8x8xf32>
    %cst_53 = arith.constant dense<0.000000e+00> : vector<8x32xf32>
    %122 = tpu.matmul %121, %26, %cst_53 {dimension_numbers = #tpu.dot_dimension_numbers<[1], [0], [0], [1], [0, 0, 1, 1], [], []>} : vector<8x8xf32>, vector<8x32xf32>, vector<8x32xf32> -> vector<8x32xf32>
    %c64 = arith.constant 64 : index
    %c0_54 = arith.constant 0 : index
    %123 = vector.load %arg10[%c64, %c0_54] : memref<128x128xf32, #tpu.memory_space<vmem>>, vector<32x128xf32>
    %cst_55 = arith.constant dense<0.000000e+00> : vector<8x128xf32>
    %124 = tpu.matmul %122, %123, %cst_55 {dimension_numbers = #tpu.dot_dimension_numbers<[1], [0], [0], [1], [0, 0, 1, 1], [], []>} : vector<8x32xf32>, vector<32x128xf32>, vector<8x128xf32> -> vector<8x128xf32>
    %125 = arith.addf %97, %124 : vector<8x128xf32>
    %126 = vector.extract_strided_slice %22 {offsets = [0, 96], sizes = [8, 32], strides = [1, 1]} : vector<8x128xf32> to vector<8x32xf32>
    %127 = vector.extract_strided_slice %126 {offsets = [0, 16], sizes = [8, 16], strides = [1, 1]} : vector<8x32xf32> to vector<8x16xf32>
    %cst_56 = arith.constant 0.000000e+00 : f32
    %128 = vector.broadcast %cst_56 : f32 to vector<8x16xf32>
    %129 = arith.subf %128, %127 : vector<8x16xf32>
    %130 = vector.extract_strided_slice %126 {offsets = [0, 0], sizes = [8, 16], strides = [1, 1]} : vector<8x32xf32> to vector<8x16xf32>
    %131 = tpu.concatenate %129, %130 in 1 : vector<8x16xf32>, vector<8x16xf32> -> vector<8x32xf32>
    %132 = arith.mulf %126, %31 : vector<8x32xf32>
    %133 = arith.mulf %131, %32 : vector<8x32xf32>
    %134 = arith.addf %132, %133 : vector<8x32xf32>
    %cst_57 = arith.constant 0.176776692 : f32
    %135 = vector.broadcast %cst_57 : f32 to vector<8x32xf32>
    %136 = arith.mulf %134, %135 : vector<8x32xf32>
    %cst_58 = arith.constant dense<0.000000e+00> : vector<8x8xf32>
    %137 = tpu.matmul %136, %40, %cst_58 {dimension_numbers = #tpu.dot_dimension_numbers<[1], [1], [0], [0], [0, 0, 1, 0], [], []>} : vector<8x32xf32>, vector<8x32xf32>, vector<8x8xf32> -> vector<8x8xf32>
    %138 = arith.cmpi sgt, %42, %41 : vector<8x8xi32>
    %cst_59 = arith.constant -3.40282347E+38 : f32
    %139 = vector.broadcast %cst_59 : f32 to vector<8x8xf32>
    %140 = arith.select %138, %139, %137 : vector<8x8xi1>, vector<8x8xf32>
    %cst_60 = arith.constant dense<0xFF800000> : vector<8xf32>
    %141 = vector.multi_reduction <maximumf>, %140, %cst_60 [1] : vector<8x8xf32> to vector<8xf32>
    %142 = vector.shape_cast %141 : vector<8xf32> to vector<8x1xf32>
    %143 = vector.broadcast %142 : vector<8x1xf32> to vector<8x8xf32>
    %144 = arith.subf %140, %143 : vector<8x8xf32>
    %145 = math.exp %144 : vector<8x8xf32>
    %cst_61 = arith.constant dense<0.000000e+00> : vector<8xf32>
    %146 = vector.multi_reduction <add>, %145, %cst_61 [1] : vector<8x8xf32> to vector<8xf32>
    %147 = vector.shape_cast %146 : vector<8xf32> to vector<8x1xf32>
    %148 = vector.broadcast %147 : vector<8x1xf32> to vector<8x8xf32>
    %149 = arith.divf %145, %148 : vector<8x8xf32>
    %cst_62 = arith.constant dense<0.000000e+00> : vector<8x32xf32>
    %150 = tpu.matmul %149, %26, %cst_62 {dimension_numbers = #tpu.dot_dimension_numbers<[1], [0], [0], [1], [0, 0, 1, 1], [], []>} : vector<8x8xf32>, vector<8x32xf32>, vector<8x32xf32> -> vector<8x32xf32>
    %c96 = arith.constant 96 : index
    %c0_63 = arith.constant 0 : index
    %151 = vector.load %arg10[%c96, %c0_63] : memref<128x128xf32, #tpu.memory_space<vmem>>, vector<32x128xf32>
    %cst_64 = arith.constant dense<0.000000e+00> : vector<8x128xf32>
    %152 = tpu.matmul %150, %151, %cst_64 {dimension_numbers = #tpu.dot_dimension_numbers<[1], [0], [0], [1], [0, 0, 1, 1], [], []>} : vector<8x32xf32>, vector<32x128xf32>, vector<8x128xf32> -> vector<8x128xf32>
    %153 = arith.addf %125, %152 : vector<8x128xf32>
    %154 = arith.negf %30 : vector<8x512xf32>
    %155 = math.exp %154 : vector<8x512xf32>
    %cst_65 = arith.constant 1.000000e+00 : f32
    %156 = vector.broadcast %cst_65 : f32 to vector<8x512xf32>
    %157 = arith.addf %156, %155 : vector<8x512xf32>
    %158 = arith.divf %156, %157 : vector<8x512xf32>
    %159 = arith.mulf %30, %158 : vector<8x512xf32>
    %160 = arith.mulf %159, %28 : vector<8x512xf32>
    %c0_66 = arith.constant 0 : index
    %c0_67 = arith.constant 0 : index
    %161 = vector.load %arg11[%c0_66, %c0_67] : memref<512x128xf32, #tpu.memory_space<vmem>>, vector<512x128xf32>
    %cst_68 = arith.constant dense<0.000000e+00> : vector<8x128xf32>
    %162 = tpu.matmul %160, %161, %cst_68 {dimension_numbers = #tpu.dot_dimension_numbers<[1], [0], [0], [1], [0, 0, 1, 1], [], []>} : vector<8x512xf32>, vector<512x128xf32>, vector<8x128xf32> -> vector<8x128xf32>
    %163 = arith.addf %153, %162 : vector<8x128xf32>
    %164 = arith.addf %163, %1 : vector<8x128xf32>
    %c0_69 = arith.constant 0 : index
    %c0_70 = arith.constant 0 : index
    %c0_71 = arith.constant 0 : index
    %165 = vector.load %arg12[%c0_69, %c0_70, %c0_71] : memref<1x8x128xf32, #tpu.memory_space<vmem>>, vector<1x8x128xf32>
    %166 = vector.shape_cast %165 : vector<1x8x128xf32> to vector<8x128xf32>
    %167 = vector.shape_cast %164 : vector<8x128xf32> to vector<1x8x128xf32>
    tpu.vector_store %arg12[%c0_69, %c0_70, %c0_71], %167 {strides = array<i32>} : memref<1x8x128xf32, #tpu.memory_space<vmem>>, vector<1x8x128xf32>,
    return
  }
  func.func @transform_0(%arg0: i32) -> (i32, i32, i32) {
    %c0_i32 = arith.constant 0 : i32
    %c0_i32_0 = arith.constant 0 : i32
    %c0_i32_1 = arith.constant 0 : i32
    return %arg0, %c0_i32, %c0_i32_0 : i32, i32, i32
  }
  func.func @transform_1(%arg0: i32) -> (i32, i32) {
    %c0_i32 = arith.constant 0 : i32
    %c0_i32_0 = arith.constant 0 : i32
    %c0_i32_1 = arith.constant 0 : i32
    return %c0_i32, %c0_i32_0 : i32, i32
  }
  func.func @transform_2(%arg0: i32) -> (i32, i32) {
    %c0_i32 = arith.constant 0 : i32
    %c0_i32_0 = arith.constant 0 : i32
    %c0_i32_1 = arith.constant 0 : i32
    return %c0_i32, %c0_i32_0 : i32, i32
  }
  func.func @transform_3(%arg0: i32) -> (i32, i32) {
    %c0_i32 = arith.constant 0 : i32
    %c0_i32_0 = arith.constant 0 : i32
    %c0_i32_1 = arith.constant 0 : i32
    return %c0_i32, %c0_i32_0 : i32, i32
  }
  func.func @transform_4(%arg0: i32) -> (i32, i32) {
    %c0_i32 = arith.constant 0 : i32
    %c0_i32_0 = arith.constant 0 : i32
    %c0_i32_1 = arith.constant 0 : i32
    return %c0_i32, %c0_i32_0 : i32, i32
  }
  func.func @transform_5(%arg0: i32) -> (i32, i32) {
    %c0_i32 = arith.constant 0 : i32
    %c0_i32_0 = arith.constant 0 : i32
    %c0_i32_1 = arith.constant 0 : i32
    return %c0_i32, %c0_i32_0 : i32, i32
  }
  func.func @transform_6(%arg0: i32) -> (i32, i32) {
    %c0_i32 = arith.constant 0 : i32
    %c0_i32_0 = arith.constant 0 : i32
    %c0_i32_1 = arith.constant 0 : i32
    return %c0_i32, %c0_i32_0 : i32, i32
  }
  func.func @transform_7(%arg0: i32) -> (i32, i32) {
    %c0_i32 = arith.constant 0 : i32
    %c0_i32_0 = arith.constant 0 : i32
    %c0_i32_1 = arith.constant 0 : i32
    return %c0_i32, %c0_i32_0 : i32, i32
  }
  func.func @transform_8(%arg0: i32) -> (i32, i32) {
    %c0_i32 = arith.constant 0 : i32
    %c0_i32_0 = arith.constant 0 : i32
    %c0_i32_1 = arith.constant 0 : i32
    return %c0_i32, %c0_i32_0 : i32, i32
  }
  func.func @transform_9(%arg0: i32) -> (i32, i32) {
    %c0_i32 = arith.constant 0 : i32
    %c0_i32_0 = arith.constant 0 : i32
    %c0_i32_1 = arith.constant 0 : i32
    return %c0_i32, %c0_i32_0 : i32, i32
  }
  func.func @transform_10(%arg0: i32) -> (i32, i32) {
    %c0_i32 = arith.constant 0 : i32
    %c0_i32_0 = arith.constant 0 : i32
    %c0_i32_1 = arith.constant 0 : i32
    return %c0_i32, %c0_i32_0 : i32, i32
  }
  func.func @transform_11(%arg0: i32) -> (i32, i32, i32) {
    %c0_i32 = arith.constant 0 : i32
    %c0_i32_0 = arith.constant 0 : i32
    %c0_i32_1 = arith.constant 0 : i32
    return %arg0, %c0_i32, %c0_i32_0 : i32, i32, i32
  }
}

</mosaic_0001>

<bundles_post_ra>
// kernel: tpu_custom_call.1
= control target key start
LH: loop header
LB: loop body
LE: loop exit
PB: predicated region body
PF: predicated region fallthrough
CT: control target
= control target key end

     0   :  { %s4139_s0 = inlined_call_operand.vmem [shape: f32[2,8,128], index: 0, kind: input, shape index: {}]   ;;  %s4140_s1 = inlined_call_operand.vmem [shape: f32[8,32], index: 1, kind: input, shape index: {}]   ;;  %s4141_s2 = inlined_call_operand.vmem [shape: f32[8,32], index: 2, kind: input, shape index: {}]   ;;  %s4142_s3 = inlined_call_operand.vmem [shape: f32[1,128], index: 3, kind: input, shape index: {}]   ;;  %s4143_s4 = inlined_call_operand.vmem [shape: f32[128,128], index: 4, kind: input, shape index: {}]   ;;  %s4144_s5 = inlined_call_operand.vmem [shape: f32[128,32], index: 5, kind: input, shape index: {}]   ;;  %s4145_s6 = inlined_call_operand.vmem [shape: f32[128,32], index: 6, kind: input, shape index: {}]   ;;  %s4146_s7 = inlined_call_operand.hbm [shape: f32[128,512], index: 7, kind: input, shape index: {}]   ;;  %s4147_s8 = inlined_call_operand.hbm [shape: f32[128,512], index: 8, kind: input, shape index: {}]   ;;  %s4148_s9 = inlined_call_operand.vmem [shape: f32[128,128], index: 9, kind: input, shape index: {}]   ;;  %s4149_s10 = inlined_call_operand.hbm [shape: f32[512,128], index: 10, kind: input, shape index: {}]   ;;  %s4150_s11 = inlined_call_operand.hbm [shape: f32[2,8,128], index: 11, kind: output, shape index: {}]  }
   0x1   :  { %4161 = sst [smem:[#allocation18_spill]] %s4150_s11 }
   0x2   :  { %16 = vsyncpa [#allocation3], 0 }
   0x3   :  { %17 = vsyncpa [#allocation6], 0 }
   0x4   :  { %18 = vsyncpa [#allocation4], 0 }
   0x5   :  { %20 = vsyncpa [#allocation4 + $0x1], 0  ;;  %s3527_s17 = smov 0   ;;  %s3529_s18 = smov 0  }
   0x6   :  { %s3531_s19 = smov 0   ;;  %s3533_s20 = smov 0  }
   0x7 LB: > { %4162 = sst [smem:[#allocation12_spill]] %s3435_s17  ;;  %s3548_s21 = sadd.s32 4294967295, %s3447_s20   ;;  %s3447_s20 = sphi %s3533_s20, %s4184_s20   ;;  %s3443_s19 = sphi %s3531_s19, %s4186_s19   ;;  %s3439_s18 = sphi %s3529_s18, %s4188_s18   ;;  %s3435_s17 = sphi %s3527_s17, %s4187_s17  }
   0x8   : > { %4163 = sst [smem:[#allocation13_spill]] %s3443_s19  ;;  %s2503_s22 = sadd.s32 4294967294, %s3447_s20  }
   0x9   : > { %4164 = sst [smem:[#allocation14_spill]] %s3447_s20  ;;  %s3552_s23 = sadd.s32 1, %s3447_s20  }
   0xa   : > { %4165 = sst [smem:[#allocation15_spill]] %s3552_s23  ;;  %s269_s24 = sadd.s32 1, %s3443_s19 }
   0xb   : > { %s266_s25 = ssub.s32 %s3447_s20, %s3552_s23  ;;  %p279_p0 = scmp.ne.s32.totalorder %s3443_s19, %s3439_s18 }
   0xc   : > { %p267_p1 = scmp.eq.s32.totalorder %s266_s25, 0  ;;  %p280_p2 = scmp.eq.s32.totalorder %s3548_s21, 1 }
   0xd   : > { %p285_p3 = scmp.ne.s32.totalorder %s3439_s18, %s3435_s17  ;;  %p286_p4 = scmp.eq.s32.totalorder %s2503_s22, 1 }
   0xe   : > { %s3563_s26 = scalar_select %p267_p1, %s3443_s19, %s269_s24  }
   0xf   : > { %p3565_p5 = por %p280_p2, %p279_p0  ;;  %p3569_p6 = por %p286_p4, %p285_p3 }
  0x10   : > { %4166 = sst [smem:[#allocation16_spill]] %s3563_s26  ;;  %p2504_p7 = scmp.ge.s32.totalorder %s3447_s20, 1 }
  0x11   : > { %s4167_s27 = scalar_select %p3565_p5, 1, 0 }
  0x12   : > { %s4168_s28 = scalar_select %p3569_p6, 1, 0 }
  0x13   : > { %p293_p8 = scmp.lt.s32.totalorder %s3447_s20, 3  ;;  %p4154_p9 = scmp.eq.s32.totalorder %s3548_s21, 0 }
  0x14   : > { %4169 = sst [smem:[#allocation17_spill]] %s4168_s28  ;;  %s3449_s30 = smov [#allocation5]  }
  0x15   : > { %p3576_p10 = pnand %p2504_p7, %p293_p8  ;;  %s336_s12 = sshll.u32 %s3449_s30, 4  ;;  %s3582_s12 = int_to_ptr.vmem [resolvable:$true] %s336_s12 }
  0x16   : > { %s3450_s14 = smov [#allocation2]   ;;  %s3451_s16 = smov [#allocation7]  }
  0x17   : > { %s4170_s29 = scalar_select %p3576_p10, 1, 0 }
  0x18   : > { %p3188_p11 = pneg %p3576_p10  ;;  %s323_s15 = sshll.u32 %s3450_s14, 4  ;;  %s3590_s15 = int_to_ptr.vmem [resolvable:$true] %s323_s15 }
  0x19   : > { %s3592_s22 = sshll.u32 %s3451_s16, 4  ;;  %s3293_s26 = scalar_lea.hbm %s4147_s8, 8192  ;;  %s353_s22 = int_to_ptr.vmem [resolvable:$true] %s3592_s22 }
  0x1a   : > { %p3586_p12 = pnand %p4154_p9, %p3188_p11  ;;  %p3294_p13 = scmp.ne.s32.totalorder %s4147_s8, %s3293_s26 }
  0x1b   : > { %p3300_p3 = scmp.lt.u32.totalorder %s3293_s26, %s4147_s8 }
  0x1c   : > { %p3602_p0 = pneg %p3586_p12 }
  0x1e   : > { %p3296_p1 = pnand %p3602_p0, %p3294_p13 }
  0x20   : > { %p3297_p2 = pneg %p3296_p1 }
  0x22   : > { %p3302_p4 = pnand %p3300_p3, %p3297_p2 }
  0x24   : > { %3305 = shalt.err (!%p3302_p4)
}
  0x25   : > { %s3306_s19 = scalar_lea.vmem %s3582_s12, 8192  ;;  %p3314_p9 = scmp.lt.s32.totalorder %s3582_s12, %s3582_s12 }
  0x26   : > { %p3307_p7 = scmp.ne.s32.totalorder %s3582_s12, %s3306_s19  ;;  %p3315_p6 = scmp.lt.s32.totalorder %s3306_s19, %s3306_s19 }
  0x28   : > { %p3309_p8 = pnand %p3307_p7, %p3602_p0  ;;  %p3316_p13 = por %p3315_p6, %p3314_p9 }
  0x2a   : > { %p3310_p11 = pneg %p3309_p8 }
  0x2c   : > { %p3317_p1 = pnand %p3316_p13, %p3310_p11 }
  0x2e   : > { %3320 = shalt.err (!%p3317_p1)
}
  0x2f   : > { %s3452_s24 = smov 512   ;;  %s3453_s26 = smov 32  }
  0x30   : > { %3194 = dma.hbm_to_vmem [thread:$0]  (!%p3586_p12), %s4147_s8, 8192, %s3582_s12, [#allocation6], %s3452_s24, %s3452_s24, %s3453_s26  }
  0x31   : > { %s3321_s28 = scalar_lea.hbm %s4146_s7, 8192 }
  0x32   : > { %p3322_p6 = scmp.ne.s32.totalorder %s4146_s7, %s3321_s28  ;;  %p3328_p3 = scmp.lt.u32.totalorder %s3321_s28, %s4146_s7 }
  0x34   : > { %p3324_p9 = pnand %p3322_p6, %p3602_p0 }
  0x36   : > { %p3325_p2 = pneg %p3324_p9 }
  0x38   : > { %p3330_p4 = pnand %p3328_p3, %p3325_p2 }
  0x3a   : > { %3333 = shalt.err (!%p3330_p4)
}
  0x3b   : > { %s3334_s12 = scalar_lea.vmem %s3590_s15, 8192  ;;  %p3342_p13 = scmp.lt.s32.totalorder %s3590_s15, %s3590_s15 }
  0x3c   : > { %p3335_p7 = scmp.ne.s32.totalorder %s3590_s15, %s3334_s12  ;;  %p3343_p1 = scmp.lt.s32.totalorder %s3334_s12, %s3334_s12 }
  0x3e   : > { %p3337_p8 = pnand %p3335_p7, %p3602_p0  ;;  %p3344_p6 = por %p3343_p1, %p3342_p13 }
  0x40   : > { %p3338_p11 = pneg %p3337_p8 }
  0x42   : > { %p3345_p9 = pnand %p3344_p6, %p3338_p11 }
  0x44   : > { %3348 = shalt.err (!%p3345_p9)
}
  0x45   : > { %3191 = dma.hbm_to_vmem [thread:$0]  (!%p3586_p12), %s4146_s7, 8192, %s3590_s15, [#allocation3], %s3452_s24, %s3452_s24, %s3453_s26  }
  0x46   : > { %s3349_s25 = scalar_lea.hbm %s4149_s10, 8192 }
  0x47   : > { %p3350_p2 = scmp.ne.s32.totalorder %s4149_s10, %s3349_s25  ;;  %p3356_p7 = scmp.lt.u32.totalorder %s3349_s25, %s4149_s10 }
  0x49   : > { %p3352_p3 = pnand %p3350_p2, %p3602_p0 }
  0x4b   : > { %p3353_p4 = pneg %p3352_p3 }
  0x4d   : > { %p3358_p8 = pnand %p3356_p7, %p3353_p4 }
  0x4f   : > { %3361 = shalt.err (!%p3358_p8)
}
  0x50   : > { %s3362_s12 = scalar_lea.vmem %s353_s22, 8192  ;;  %p3370_p6 = scmp.lt.s32.totalorder %s353_s22, %s353_s22 }
  0x51   : > { %p3363_p11 = scmp.ne.s32.totalorder %s353_s22, %s3362_s12  ;;  %p3371_p9 = scmp.lt.s32.totalorder %s3362_s12, %s3362_s12 }
  0x53   : > { %p3365_p13 = pnand %p3363_p11, %p3602_p0  ;;  %p3372_p5 = por %p3371_p9, %p3370_p6 }
  0x55   : > { %p3366_p1 = pneg %p3365_p13 }
  0x57   : > { %p3373_p10 = pnand %p3372_p5, %p3366_p1 }
  0x59   : > { %3376 = shalt.err (!%p3373_p10)
}
  0x5a   : > { %s3454_s15 = smov 128   ;;  %s3455_s24 = smov 8  }
  0x5b   : > { %3197 = dma.hbm_to_vmem [thread:$0]  (!%p3586_p12), %s4149_s10, 8192, %s353_s22, [#allocation6], %s3454_s15, %s3454_s15, %s3455_s24  }
  0x5c   : > { %p4173_p2 = scmp.ne.s32.totalorder %s4170_s29, 0 }
  0x5d   : > { %p4174_p3 = scmp.eq.s32.totalorder (!%p4173_p2), %s3548_s21, 0 }
  0x5e   : > { %375 = sbr.rel (%p4173_p2) target bundleno = 3588 (0xe04), region = 64 }
  0x65   : > { %3422 = dma.done.wait (%p4174_p3), [#allocation3], 8192   ;;  %p4175_p0 = pmov %p4174_p3 }
  0x67   : > { %3424 = vsyncadd (%p4175_p0), [#allocation3], 4294959104  ;;  %p4176_p5 = pmov %p4175_p0 }
  0x68   : > { %p4177_p10 = pmov %p4175_p0 }
  0x69   : > { %3426 = dma.done.wait (%p4176_p5), [#allocation6], 16384  }
  0x6a   : > { %3428 = vsyncadd (%p4177_p10), [#allocation6], 4294950912  ;;  %p422_p4 = scmp.lt.s32.totalorder %s3548_s21, 1  ;;  %v447_v1 = vld [vmem:[%s4143_s4] sm:$0xff]  ;;  %v448_v2 = vld [vmem:[%s4143_s4 + $0x8] sm:$0xff]  ;;  %v3456_v4 = vmov 0.0|0.0  }
  0x6b   : > { %v533_v3 = vld [vmem:[%s4144_s5] sm:$0xff]  ;;  %2886 = vmatprep.subr.bf16.mxu0 %v3456_v4  ;;  %2910 = vmatprep.subr.bf16.mxu1 %v3456_v4  ;;  %v2887_v5 = vpack.c.bf16 %v448_v2, %v447_v1  ;;  %v534_v6 = vld [vmem:[%s4144_s5 + $0x8] sm:$0xff]  ;;  %v449_v7 = vld [vmem:[%s4143_s4 + $0x10] sm:$0xff]  ;;  %vm3457_vm0 = vmmov 0   ;;  %v3458_v57 = vmov 0.0   ;;  %s3459_s25 = smov 16  }
  0x6c   : > { %s423_s23 = scalar_select %p422_p4, %s3548_s21, 1  ;;  %v450_v8 = vld [vmem:[%s4143_s4 + $0x18] sm:$0xff]  ;;  %v2911_v9 = vpack.c.bf16 %v534_v6, %v533_v3  ;;  %v535_v10 = vld [vmem:[%s4144_s5 + $0x10] sm:$0xff]  ;;  %v451_v14 = vld [vmem:[%s4143_s4 + $0x20] sm:$0xff]  ;;  %2729 = vmatprep.mubr.msk.f32.mxu0 %vm3457_vm0, %v3458_v57  ;;  %2764 = vmatprep.mubr.msk.f32.mxu1 %vm3457_vm0, %v3458_v57  ;;  %vm1128_vm1 = vcmask 130048   ;;  %vm1151_vm2 = vcmask 261120  }
  0x6d   : > { %v536_v11 = vld [vmem:[%s4144_s5 + $0x18] sm:$0xff]  ;;  %2888 = vmatpush3.bf16.msra.mxu0 %v2887_v5  ;;  %v2890_v12 = vpack.c.bf16 %v450_v8, %v449_v7  ;;  %v452_v15 = vld [vmem:[%s4143_s4 + $0x28] sm:$0xff]  ;;  %v537_v16 = vld [vmem:[%s4144_s5 + $0x20] sm:$0xff]  ;;  %s3460_s30 = smov 112   ;;  %s3461_s19 = smov 32   ;;  %vm1230_vm4 = vcmask 64512  }
  0x6e   : > { %s2514_s13 = sshll.u32 %s423_s23, 3  ;;  %2912 = vmatpush3.bf16.msra.mxu1 %v2911_v9  ;;  %2889 = vmatprep.subr.bf16.mxu0 %v3456_v4  ;;  %v2914_v13 = vpack.c.bf16 %v536_v11, %v535_v10  ;;  %v538_v17 = vld [vmem:[%s4144_s5 + $0x28] sm:$0xff]  ;;  %v2893_v18 = vpack.c.bf16 %v452_v15, %v451_v14  ;;  %v453_v20 = vld [vmem:[%s4143_s4 + $0x30] sm:$0xff]  ;;  %v454_v21 = vld [vmem:[%s4143_s4 + $0x38] sm:$0xff]  ;;  %s3462_s12 = smov 80  }
  0x6f   : > { %s3680_s17 = scalar_lea.vmem %s4139_s0, %s2514_s13  ;;  %2913 = vmatprep.subr.bf16.mxu1 %v3456_v4  ;;  %v2917_v19 = vpack.c.bf16 %v538_v17, %v537_v16  ;;  %v539_v22 = vld [vmem:[%s4144_s5 + $0x30] sm:$0xff]  ;;  %v540_v23 = vld [vmem:[%s4144_s5 + $0x38] sm:$0xff]  ;;  %v2896_v24 = vpack.c.bf16 %v454_v21, %v453_v20  ;;  %v455_v30 = vld [vmem:[%s4143_s4 + $0x40] sm:$0xff]  ;;  %s3463_s26 = smov 96  }
  0x70   : > { %v426_v0 = vld [vmem:[%s3680_s17] sm:$0xff]  ;;  %v2920_v25 = vpack.c.bf16 %v540_v23, %v539_v22  ;;  %v456_v31 = vld [vmem:[%s4143_s4 + $0x48] sm:$0xff]  ;;  %v457_v36 = vld [vmem:[%s4143_s4 + $0x50] sm:$0xff]  ;;  %s3464_s11 = smov 48   ;;  %s3465_s23 = smov 64  }
  0x71   : > { %427 = vadd.xlane.f32.xlu0 %v426_v0  ;;  %2891 = vmatpush3.bf16.msra.mxu0 %v2890_v12  ;;  %v541_v32 = vld [vmem:[%s4144_s5 + $0x40] sm:$0xff]  ;;  %v2899_v33 = vpack.c.bf16 %v456_v31, %v455_v30  ;;  %v542_v34 = vld [vmem:[%s4144_s5 + $0x48] sm:$0xff]  ;;  %v458_v37 = vld [vmem:[%s4143_s4 + $0x58] sm:$0xff]  ;;  %s4178_s16 = sld [smem:[#allocation18_spill]]  ;;  %p4179_p7 = scmp.ne.s32.totalorder %s4167_s27, 0 }
  0x72   : > { %2915 = vmatpush3.bf16.msra.mxu1 %v2914_v13  ;;  %2892 = vmatprep.subr.bf16.mxu0 %v3456_v4  ;;  %v2923_v35 = vpack.c.bf16 %v542_v34, %v541_v32  ;;  %v543_v38 = vld [vmem:[%s4144_s5 + $0x50] sm:$0xff]  ;;  %v2902_v39 = vpack.c.bf16 %v458_v37, %v457_v36  ;;  %v544_v40 = vld [vmem:[%s4144_s5 + $0x58] sm:$0xff]  ;;  %v459_v42 = vld [vmem:[%s4143_s4 + $0x60] sm:$0xff] }
  0x73   : > { %2916 = vmatprep.subr.bf16.mxu1 %v3456_v4  ;;  %v2926_v41 = vpack.c.bf16 %v544_v40, %v543_v38  ;;  %v460_v43 = vld [vmem:[%s4143_s4 + $0x68] sm:$0xff]  ;;  %v545_v44 = vld [vmem:[%s4144_s5 + $0x60] sm:$0xff]  ;;  %v461_v48 = vld [vmem:[%s4143_s4 + $0x70] sm:$0xff] }
  0x74   : > { %v2905_v45 = vpack.c.bf16 %v460_v43, %v459_v42  ;;  %v546_v46 = vld [vmem:[%s4144_s5 + $0x68] sm:$0xff]  ;;  %v462_v49 = vld [vmem:[%s4143_s4 + $0x78] sm:$0xff]  ;;  %v547_v50 = vld [vmem:[%s4144_s5 + $0x70] sm:$0xff] }
  0x75   : > { %2894 = vmatpush3.bf16.msra.mxu0 %v2893_v18  ;;  %v2929_v47 = vpack.c.bf16 %v546_v46, %v545_v44  ;;  %v2908_v51 = vpack.c.bf16 %v462_v49, %v461_v48  ;;  %v548_v52 = vld [vmem:[%s4144_s5 + $0x78] sm:$0xff]  ;;  %v706_v54 = vld [vmem:[#allocation2 + $0x8] sm:$0xff]  ;;  %v619_v61 = vld [vmem:[%s4145_s6] sm:$0xff] }
  0x76   : > { %2918 = vmatpush3.bf16.msra.mxu1 %v2917_v19  ;;  %2895 = vmatprep.subr.bf16.mxu0 %v3456_v4  ;;  %v2932_v53 = vpack.c.bf16 %v548_v52, %v547_v50  ;;  %v710_v55 = vld [vmem:[#allocation2 + $0x28] sm:$0xff]  ;;  %v705_v63 = vld [vmem:[#allocation2] sm:$0xff]  ;;  %v621_v9 = vld [vmem:[%s4145_s6 + $0x10] sm:$0xff] }
  0x77   : > { %2919 = vmatprep.subr.bf16.mxu1 %v3456_v4  ;;  %v2958_v56 = vpack.c.bf16 %v710_v55, %v706_v54  ;;  %v620_v62 = vld [vmem:[%s4145_s6 + $0x8] sm:$0xff]  ;;  %v2515_v2 = vld [vmem:[%s4142_s3] ss:$0 sm:$0xff]  ;;  %v622_v12 = vld [vmem:[%s4145_s6 + $0x18] sm:$0xff] }
  0x78   : > { %v714_v3 = vld [vmem:[#allocation2 + $0x48] sm:$0xff]  ;;  %v2935_v7 = vpack.c.bf16 %v620_v62, %v619_v61  ;;  %v713_v13 = vld [vmem:[#allocation2 + $0x40] sm:$0xff]  ;;  %v2938_v17 = vpack.c.bf16 %v622_v12, %v621_v9  ;;  %v626_v30 = vld [vmem:[%s4145_s6 + $0x38] sm:$0xff] }
  0x79   : > { %2897 = vmatpush3.bf16.msra.mxu0 %v2896_v24  ;;  %v718_v5 = vld [vmem:[#allocation2 + $0x68] sm:$0xff]  ;;  %v717_v14 = vld [vmem:[#allocation2 + $0x60] sm:$0xff]  ;;  %v629_v46 = vld [vmem:[%s4145_s6 + $0x50] sm:$0xff] }
  0x7a   : > { %2921 = vmatpush3.bf16.msra.mxu1 %v2920_v25  ;;  %2898 = vmatprep.subr.bf16.mxu0 %v3456_v4  ;;  %v2962_v11 = vpack.c.bf16 %v718_v5, %v714_v3  ;;  %v722_v15 = vld [vmem:[#allocation2 + $0x88] sm:$0xff]  ;;  %v2964_v18 = vpack.c.bf16 %v717_v14, %v713_v13  ;;  %v623_v19 = vld [vmem:[%s4145_s6 + $0x20] sm:$0xff]  ;;  %v630_v48 = vld [vmem:[%s4145_s6 + $0x58] sm:$0xff] }
  0x7b   : > { %2922 = vmatprep.subr.bf16.mxu1 %v3456_v4  ;;  %v726_v16 = vld [vmem:[#allocation2 + $0xa8] sm:$0xff]  ;;  %v721_v22 = vld [vmem:[#allocation2 + $0x80] sm:$0xff]  ;;  %v707_v14 = vld [vmem:[#allocation2 + $0x10] sm:$0xff] }
  0x7c   : > { %v2966_v20 = vpack.c.bf16 %v726_v16, %v722_v15  ;;  %v624_v21 = vld [vmem:[%s4145_s6 + $0x28] sm:$0xff]  ;;  %v725_v23 = vld [vmem:[#allocation2 + $0xa0] sm:$0xff]  ;;  %v711_v15 = vld [vmem:[#allocation2 + $0x30] sm:$0xff] }
  0x7d   : > { %2900 = vmatpush3.bf16.msra.mxu0 %v2899_v33  ;;  %v730_v24 = vld [vmem:[#allocation2 + $0xc8] sm:$0xff]  ;;  %v729_v31 = vld [vmem:[#allocation2 + $0xc0] sm:$0xff] }
  0x7e   : > { %2924 = vmatpush3.bf16.msra.mxu1 %v2923_v35  ;;  %2901 = vmatprep.subr.bf16.mxu0 %v3456_v4  ;;  %v734_v25 = vld [vmem:[#allocation2 + $0xe8] sm:$0xff]  ;;  %v733_v32 = vld [vmem:[#allocation2 + $0xe0] sm:$0xff] }
  0x7f   : > { %2925 = vmatprep.subr.bf16.mxu1 %v3456_v4  ;;  %v738_v33 = vld [vmem:[#allocation2 + $0x108] sm:$0xff]  ;;  %v2972_v36 = vpack.c.bf16 %v733_v32, %v729_v31  ;;  %v627_v37 = vld [vmem:[%s4145_s6 + $0x40] sm:$0xff]  ;;  %v724_v32 = vld [vmem:[#allocation2 + $0x98] sm:$0xff] }
  0x80   : > { %v742_v34 = vld [vmem:[#allocation2 + $0x128] sm:$0xff]  ;;  %v737_v40 = vld [vmem:[#allocation2 + $0x100] sm:$0xff] }
  0x81   : > { %2903 = vmatpush3.bf16.msra.mxu0 %v2902_v39  ;;  %v2974_v38 = vpack.c.bf16 %v742_v34, %v738_v33  ;;  %v628_v39 = vld [vmem:[%s4145_s6 + $0x48] sm:$0xff]  ;;  %v745_v49 = vld [vmem:[#allocation2 + $0x140] sm:$0xff]  ;;  %v728_v33 = vld [vmem:[#allocation2 + $0xb8] sm:$0xff] }
  0x82   : > { %2927 = vmatpush3.bf16.msra.mxu1 %v2926_v41  ;;  %2904 = vmatprep.subr.bf16.mxu0 %v3456_v4  ;;  %v741_v41 = vld [vmem:[#allocation2 + $0x120] sm:$0xff]  ;;  %v746_v42 = vld [vmem:[#allocation2 + $0x148] sm:$0xff]  ;;  %v2947_v44 = vpack.c.bf16 %v628_v39, %v627_v37  ;;  %v727_v39 = vld [vmem:[#allocation2 + $0xb0] sm:$0xff] }
  0x83   : > { %2928 = vmatprep.subr.bf16.mxu1 %v3456_v4  ;;  %v750_v43 = vld [vmem:[#allocation2 + $0x168] sm:$0xff]  ;;  %v749_v50 = vld [vmem:[#allocation2 + $0x160] sm:$0xff] }
  0x84   : > { %v758_v52 = vld [vmem:[#allocation2 + $0x1a8] sm:$0xff]  ;;  %v2980_v54 = vpack.c.bf16 %v749_v50, %v745_v49  ;;  %v631_v55 = vld [vmem:[%s4145_s6 + $0x60] sm:$0xff]  ;;  %v731_v50 = vld [vmem:[#allocation2 + $0xd0] sm:$0xff] }
  0x85   : > { %2906 = vmatpush3.bf16.msra.mxu0 %v2905_v45  ;;  %v2976_v45 = vpack.c.bf16 %v741_v41, %v737_v40  ;;  %v762_v61 = vld [vmem:[#allocation2 + $0x1c8] sm:$0xff]  ;;  %v761_v5 = vld [vmem:[#allocation2 + $0x1c0] sm:$0xff]  ;;  %v2998_v40 = vpack.c.bf16 %v728_v33, %v724_v32  ;;  %v768_v32 = vld [vmem:[#allocation2 + $0x1f8] sm:$0xff] }
  0x86   : > { %2930 = vmatpush3.bf16.msra.mxu1 %v2929_v47  ;;  %2907 = vmatprep.subr.bf16.mxu0 %v3456_v4  ;;  %v2978_v47 = vpack.c.bf16 %v750_v43, %v746_v42  ;;  %v766_v62 = vld [vmem:[#allocation2 + $0x1e8] sm:$0xff]  ;;  %v923_v31 = vld [vmem:[#allocation5 + $0x60] sm:$0xff] }
  0x87   : > { %2931 = vmatprep.subr.bf16.mxu1 %v3456_v4  ;;  %v2986_v3 = vpack.c.bf16 %v766_v62, %v762_v61  ;;  %v912_v9 = vld [vmem:[#allocation5 + $0x8] sm:$0xff]  ;;  %v927_v42 = vld [vmem:[#allocation5 + $0x80] sm:$0xff] }
  0x88   : > { %v928_v34 = vld [vmem:[#allocation5 + $0x88] sm:$0xff]  ;;  %v931_v43 = vld [vmem:[#allocation5 + $0xa0] sm:$0xff] }
  0x89   : > { %2909 = vmatpush3.bf16.msra.mxu0 %v2908_v51  ;;  %v754_v51 = vld [vmem:[#allocation2 + $0x188] sm:$0xff]  ;;  %v3032_v49 = vpack.c.bf16 %v931_v43, %v927_v42  ;;  %v971_v42 = vld [vmem:[#allocation5 + $0x1e0] sm:$0xff]  ;;  %v914_v43 = vld [vmem:[#allocation5 + $0x18] sm:$0xff] }
  0x8a   : > { %2933 = vmatpush3.bf16.msra.mxu1 %v2932_v53  ;;  %2934 = vmatprep.subr.bf16.mxu0 %v3456_v4  ;;  %v2950_v53 = vpack.c.bf16 %v630_v48, %v629_v46  ;;  %v936_v46 = vld [vmem:[#allocation5 + $0xc8] sm:$0xff] }
  0x8b   : > { %2959 = vmatprep.subr.bf16.mxu1 %v2958_v56  ;;  %v2982_v56 = vpack.c.bf16 %v758_v52, %v754_v51  ;;  %v735_v51 = vld [vmem:[#allocation2 + $0xf0] sm:$0xff]  ;;  %v968_v33 = vld [vmem:[#allocation5 + $0x1c8] sm:$0xff] }
  0x8c   : > { %v3004_v61 = vpack.c.bf16 %v735_v51, %v731_v50  ;;  %v922_v50 = vld [vmem:[#allocation5 + $0x58] sm:$0xff] }
  0x8d   : > { %v926_v51 = vld [vmem:[#allocation5 + $0x78] sm:$0xff] }
  0xfe   : > { %v428_v26 = vpop.xlane.xlu0 %427 }
  0xff   : > { %v430_v27 = vmul.f32 0.0078125, %v428_v26  ;;  %v2941_v26 = vpack.c.bf16 %v624_v21, %v623_v19  ;;  %v915_v19 = vld [vmem:[#allocation5 + $0x20] sm:$0xff]  ;;  %v720_v21 = vld [vmem:[#allocation2 + $0x78] sm:$0xff] }
 0x101   : > { %v431_v28 = vsub.f32 %v426_v0, %v430_v27  ;;  %v709_v0 = vld [vmem:[#allocation2 + $0x20] sm:$0xff]  ;;  %v2968_v27 = vpack.c.bf16 %v725_v23, %v721_v22  ;;  %v920_v22 = vld [vmem:[#allocation5 + $0x48] sm:$0xff] }
 0x102   : > { %v2960_v8 = vpack.c.bf16 %v709_v0, %v705_v63  ;;  %v924_v23 = vld [vmem:[#allocation5 + $0x68] sm:$0xff] }
 0x103   : > { %v432_v29 = vmul.f32 %v431_v28, %v431_v28 }
 0x105   : > { %433 = vadd.xlane.f32.xlu0 %v432_v29  ;;  %v2970_v29 = vpack.c.bf16 %v734_v25, %v730_v24  ;;  %v2992_v24 = vpack.c.bf16 %v711_v15, %v707_v14  ;;  %v751_v14 = vld [vmem:[#allocation2 + $0x170] sm:$0xff] }
 0x192   : > { %v434_v58 = vpop.xlane.xlu0 %433 }
 0x193   : > { %v435_v59 = vmul.f32 0.0078125, %v434_v58  ;;  %v632_v58 = vld [vmem:[%s4145_s6 + $0x68] sm:$0xff] }
 0x194   : > { %v2953_v63 = vpack.c.bf16 %v632_v58, %v631_v55  ;;  %v939_v55 = vld [vmem:[#allocation5 + $0xe0] sm:$0xff]  ;;  %v744_v58 = vld [vmem:[#allocation2 + $0x138] sm:$0xff] }
 0x195   : > { %v436_v60 = vadd.f32 1e-05, %v435_v59  ;;  %v753_v59 = vld [vmem:[#allocation2 + $0x180] sm:$0xff] }
 0x197   : > { %3258 = vrsqrt.f32 %v436_v60  ;;  %v757_v60 = vld [vmem:[#allocation2 + $0x1a0] sm:$0xff] }
 0x198   : > { %v2984_v0 = vpack.c.bf16 %v757_v60, %v753_v59  ;;  %v944_v59 = vld [vmem:[#allocation5 + $0x108] sm:$0xff] }
 0x199   : > { %v948_v60 = vld [vmem:[#allocation5 + $0x128] sm:$0xff] }
 0x1a1   : > { %v3259_v1 = vpop.eup %3258 }
 0x1a2   : > { %v438_v6 = vmul.f32 %v3259_v1, %v431_v28  ;;  %v625_v28 = vld [vmem:[%s4145_s6 + $0x30] sm:$0xff] }
 0x1a3   : > { %v2944_v35 = vpack.c.bf16 %v626_v30, %v625_v28  ;;  %v633_v1 = vld [vmem:[%s4145_s6 + $0x70] sm:$0xff]  ;;  %v919_v30 = vld [vmem:[#allocation5 + $0x40] sm:$0xff] }
 0x1a4   : > { %v3812_v10 = vmul.f32 %v2515_v2, %v438_v6  ;;  %v634_v2 = vld [vmem:[%s4145_s6 + $0x78] sm:$0xff]  ;;  %v765_v6 = vld [vmem:[#allocation2 + $0x1e0] sm:$0xff]  ;;  %v3028_v37 = vpack.c.bf16 %v923_v31, %v919_v30 }
 0x1a5   : > { %v2956_v12 = vpack.c.bf16 %v634_v2, %v633_v1  ;;  %v2988_v13 = vpack.c.bf16 %v765_v6, %v761_v5  ;;  %v3038_v2 = vpack.c.bf16 %v948_v60, %v944_v59  ;;  %v947_v5 = vld [vmem:[#allocation5 + $0x120] sm:$0xff]  ;;  %v748_v6 = vld [vmem:[#allocation2 + $0x158] sm:$0xff] }
 0x1a6   : > { %2730 = vmatmul.mubr.f32.vlgmr.msra.gmra.mrb[0].mxu0 %v3812_v10  ;;  %2765 = vmatmul.mubr.f32.vlgmr.msra.gmra.mrb[0].mxu1 %v3812_v10  ;;  %v963_v30 = vld [vmem:[#allocation5 + $0x1a0] sm:$0xff]  ;;  %v764_v31 = vld [vmem:[#allocation2 + $0x1d8] sm:$0xff] }
 0x1a7   : > { %2936 = vmatpush3.bf16.msra.mxu0 %v2935_v7  ;;  %2961 = vmatpush1.bf16.msra.mxu1 %v2960_v8  ;;  %v708_v7 = vld [vmem:[#allocation2 + $0x18] sm:$0xff] }
 0x1a8   : > { %2937 = vmatprep.subr.bf16.mxu0 %v3456_v4  ;;  %2963 = vmatprep.subr.bf16.mxu1 %v2962_v11  ;;  %v712_v8 = vld [vmem:[#allocation2 + $0x38] sm:$0xff]  ;;  %v916_v11 = vld [vmem:[#allocation5 + $0x28] sm:$0xff] }
 0x1a9   : > { %2799 = vmatprep.mubr.msk.f32.mxu0 %vm3457_vm0, %v3458_v57  ;;  %833 = vmatprep.mubr.f32.mxu1 %v3458_v57  ;;  %v2990_v16 = vpack.c.bf16 %v712_v8, %v708_v7  ;;  %v752_v7 = vld [vmem:[#allocation2 + $0x178] sm:$0xff]  ;;  %v952_v8 = vld [vmem:[#allocation5 + $0x148] sm:$0xff] }
 0x1aa   : > { %v3010_v15 = vpack.c.bf16 %v752_v7, %v748_v6  ;;  %v946_v6 = vld [vmem:[#allocation5 + $0x118] sm:$0xff] }
 0x1ab   : > { %2939 = vmatpush3.bf16.msra.mxu0 %v2938_v17  ;;  %2965 = vmatpush1.bf16.msra.mxu1 %v2964_v18  ;;  %v3022_v17 = vpack.c.bf16 %v916_v11, %v912_v9  ;;  %v911_v18 = vld [vmem:[#allocation5] sm:$0xff]  ;;  %v956_v9 = vld [vmem:[#allocation5 + $0x168] sm:$0xff]  ;;  %v950_v7 = vld [vmem:[#allocation5 + $0x138] sm:$0xff] }
 0x1ac   : > { %2940 = vmatprep.subr.bf16.mxu0 %v3456_v4  ;;  %2967 = vmatprep.subr.bf16.mxu1 %v2966_v20  ;;  %v716_v20 = vld [vmem:[#allocation2 + $0x58] sm:$0xff]  ;;  %v3024_v25 = vpack.c.bf16 %v915_v19, %v911_v18  ;;  %v955_v18 = vld [vmem:[#allocation5 + $0x160] sm:$0xff] }
 0x1ad   : > { %v2994_v28 = vpack.c.bf16 %v720_v21, %v716_v20  ;;  %v756_v19 = vld [vmem:[#allocation2 + $0x198] sm:$0xff]  ;;  %v960_v21 = vld [vmem:[#allocation5 + $0x188] sm:$0xff] }
 0x1ae   : > { %v760_v20 = vld [vmem:[#allocation2 + $0x1b8] sm:$0xff] }
 0x1af   : > { %2942 = vmatpush3.bf16.msra.mxu0 %v2941_v26  ;;  %2969 = vmatpush1.bf16.msra.mxu1 %v2968_v27  ;;  %v715_v26 = vld [vmem:[#allocation2 + $0x50] sm:$0xff] }
 0x1b0   : > { %2943 = vmatprep.subr.bf16.mxu0 %v3456_v4  ;;  %2971 = vmatprep.subr.bf16.mxu1 %v2970_v29  ;;  %v719_v27 = vld [vmem:[#allocation2 + $0x70] sm:$0xff]  ;;  %v3026_v29 = vpack.c.bf16 %v924_v23, %v920_v22  ;;  %v964_v22 = vld [vmem:[#allocation5 + $0x1a8] sm:$0xff] }
 0x1b3   : > { %2945 = vmatpush3.bf16.msra.mxu0 %v2944_v35  ;;  %2973 = vmatpush1.bf16.msra.mxu1 %v2972_v36  ;;  %v932_v35 = vld [vmem:[#allocation5 + $0xa8] sm:$0xff]  ;;  %v2996_v36 = vpack.c.bf16 %v719_v27, %v715_v26  ;;  %v759_v26 = vld [vmem:[#allocation2 + $0x1b0] sm:$0xff]  ;;  %v3014_v27 = vpack.c.bf16 %v760_v20, %v756_v19  ;;  %v962_v19 = vld [vmem:[#allocation5 + $0x198] sm:$0xff] }
 0x1b4   : > { %2946 = vmatprep.subr.bf16.mxu0 %v3456_v4  ;;  %2975 = vmatprep.subr.bf16.mxu1 %v2974_v38  ;;  %v723_v38 = vld [vmem:[#allocation2 + $0x90] sm:$0xff]  ;;  %v3030_v41 = vpack.c.bf16 %v932_v35, %v928_v34  ;;  %v972_v34 = vld [vmem:[#allocation5 + $0x1e8] sm:$0xff]  ;;  %v966_v20 = vld [vmem:[#allocation5 + $0x1b8] sm:$0xff] }
 0x1b5   : > { %v3000_v48 = vpack.c.bf16 %v727_v39, %v723_v38  ;;  %v3018_v38 = vpack.c.bf16 %v768_v32, %v764_v31  ;;  %v3050_v39 = vpack.c.bf16 %v972_v34, %v968_v33 }
 0x1b7   : > { %2948 = vmatpush3.bf16.msra.mxu0 %v2947_v44  ;;  %2977 = vmatpush1.bf16.msra.mxu1 %v2976_v45  ;;  %v732_v44 = vld [vmem:[#allocation2 + $0xd8] sm:$0xff] }
 0x1b8   : > { %2949 = vmatprep.subr.bf16.mxu0 %v3456_v4  ;;  %2979 = vmatprep.subr.bf16.mxu1 %v2978_v47  ;;  %v736_v45 = vld [vmem:[#allocation2 + $0xf8] sm:$0xff]  ;;  %v940_v47 = vld [vmem:[#allocation5 + $0xe8] sm:$0xff] }
 0x1b9   : > { %v3002_v52 = vpack.c.bf16 %v736_v45, %v732_v44  ;;  %v918_v44 = vld [vmem:[#allocation5 + $0x38] sm:$0xff] }
 0x1bb   : > { %2951 = vmatpush3.bf16.msra.mxu0 %v2950_v53  ;;  %2981 = vmatpush1.bf16.msra.mxu1 %v2980_v54  ;;  %v3034_v53 = vpack.c.bf16 %v940_v47, %v936_v46  ;;  %v935_v54 = vld [vmem:[#allocation5 + $0xc0] sm:$0xff]  ;;  %v3054_v47 = vpack.c.bf16 %v918_v44, %v914_v43 }
 0x1bc   : > { %2952 = vmatprep.subr.bf16.mxu0 %v3456_v4  ;;  %2983 = vmatprep.subr.bf16.mxu1 %v2982_v56  ;;  %v740_v56 = vld [vmem:[#allocation2 + $0x118] sm:$0xff]  ;;  %v3036_v62 = vpack.c.bf16 %v939_v55, %v935_v54  ;;  %v921_v54 = vld [vmem:[#allocation5 + $0x50] sm:$0xff] }
 0x1bd   : > { %v3006_v1 = vpack.c.bf16 %v744_v58, %v740_v56  ;;  %v925_v55 = vld [vmem:[#allocation5 + $0x70] sm:$0xff]  ;;  %v930_v56 = vld [vmem:[#allocation5 + $0x98] sm:$0xff] }
 0x1be   : > { %v934_v58 = vld [vmem:[#allocation5 + $0xb8] sm:$0xff]  ;;  %v3060_v59 = vpack.c.bf16 %v925_v55, %v921_v54 }
 0x1bf   : > { %2954 = vmatpush3.bf16.msra.mxu0 %v2953_v63  ;;  %2985 = vmatpush1.bf16.msra.mxu1 %v2984_v0  ;;  %v739_v63 = vld [vmem:[#allocation2 + $0x110] sm:$0xff]  ;;  %v3062_v60 = vpack.c.bf16 %v934_v58, %v930_v56 }
 0x1c0   : > { %2955 = vmatprep.subr.bf16.mxu0 %v3456_v4  ;;  %2987 = vmatprep.subr.bf16.mxu1 %v2986_v3  ;;  %v743_v0 = vld [vmem:[#allocation2 + $0x130] sm:$0xff]  ;;  %v943_v3 = vld [vmem:[#allocation5 + $0x100] sm:$0xff] }
 0x1c1   : > { %v3008_v11 = vpack.c.bf16 %v743_v0, %v739_v63  ;;  %v938_v63 = vld [vmem:[#allocation5 + $0xd8] sm:$0xff] }
 0x1c2   : > { %v942_v0 = vld [vmem:[#allocation5 + $0xf8] sm:$0xff] }
 0x1c3   : > { %2957 = vmatpush3.bf16.msra.mxu0 %v2956_v12  ;;  %2989 = vmatpush1.bf16.msra.mxu1 %v2988_v13  ;;  %v3040_v12 = vpack.c.bf16 %v947_v5, %v943_v3  ;;  %v747_v13 = vld [vmem:[#allocation2 + $0x150] sm:$0xff] }
 0x1c4   : > { %2991 = vmatprep.subr.bf16.mxu0 %v2990_v16  ;;  %3023 = vmatprep.subr.bf16.mxu1 %v3022_v17  ;;  %v3042_v16 = vpack.c.bf16 %v956_v9, %v952_v8  ;;  %v951_v17 = vld [vmem:[#allocation5 + $0x140] sm:$0xff]  ;;  %v3012_v23 = vpack.c.bf16 %v751_v14, %v747_v13  ;;  %v937_v3 = vld [vmem:[#allocation5 + $0xd0] sm:$0xff]  ;;  %v3070_v9 = vpack.c.bf16 %v950_v7, %v946_v6  ;;  %v954_v13 = vld [vmem:[#allocation5 + $0x158] sm:$0xff] }
 0x1c5   : > { %v941_v5 = vld [vmem:[#allocation5 + $0xf0] sm:$0xff]  ;;  %v958_v14 = vld [vmem:[#allocation5 + $0x178] sm:$0xff] }
 0x1c6   : > { %2800 = vmatmul.mubr.f32.vlgmr.msra.gmra.mrb[2].mxu0 %v3812_v10  ;;  %834 = vmatmul.mubr.f32.vlgmr.msra.gmra.mrb[2].mxu1 %v3812_v10  ;;  %v3068_v8 = vpack.c.bf16 %v941_v5, %v937_v3  ;;  %v3907_v5 = vld [vmem:[%s4141_s2] sm:$0xff] }
 0x1c7   : > { %2993 = vmatpush1.bf16.msra.mxu0 %v2992_v24  ;;  %3025 = vmatpush1.bf16.msra.mxu1 %v3024_v25  ;;  %v3044_v24 = vpack.c.bf16 %v955_v18, %v951_v17  ;;  %v755_v25 = vld [vmem:[#allocation2 + $0x190] sm:$0xff] }
 0x1c8   : > { %2995 = vmatprep.subr.bf16.mxu0 %v2994_v28  ;;  %3027 = vmatprep.subr.bf16.mxu1 %v3026_v29  ;;  %v3046_v28 = vpack.c.bf16 %v964_v22, %v960_v21  ;;  %v959_v29 = vld [vmem:[#allocation5 + $0x180] sm:$0xff]  ;;  %v3016_v35 = vpack.c.bf16 %v759_v26, %v755_v25  ;;  %v953_v17 = vld [vmem:[#allocation5 + $0x150] sm:$0xff]  ;;  %v3078_v22 = vpack.c.bf16 %v966_v20, %v962_v19  ;;  %v970_v25 = vld [vmem:[#allocation5 + $0x1d8] sm:$0xff] }
 0x1c9   : > { %904 = vmatprep.mubr.f32.mxu0 %v3458_v57  ;;  %1039 = vmatprep.mubr.f32.mxu1 %v3458_v57  ;;  %v957_v18 = vld [vmem:[#allocation5 + $0x170] sm:$0xff]  ;;  %v974_v26 = vld [vmem:[#allocation5 + $0x1f8] sm:$0xff] }
 0x1ca   : > { %v3076_v21 = vpack.c.bf16 %v957_v18, %v953_v17 }
 0x1cb   : > { %2997 = vmatpush1.bf16.msra.mxu0 %v2996_v36  ;;  %3029 = vmatpush1.bf16.msra.mxu1 %v3028_v37  ;;  %v3048_v36 = vpack.c.bf16 %v963_v30, %v959_v29  ;;  %v763_v37 = vld [vmem:[#allocation2 + $0x1d0] sm:$0xff] }
 0x1cc   : > { %2999 = vmatprep.subr.bf16.mxu0 %v2998_v40  ;;  %3031 = vmatprep.subr.bf16.mxu1 %v3030_v41  ;;  %v767_v40 = vld [vmem:[#allocation2 + $0x1f0] sm:$0xff]  ;;  %v967_v41 = vld [vmem:[#allocation5 + $0x1c0] sm:$0xff] }
 0x1cd   : > { %v3020_v45 = vpack.c.bf16 %v767_v40, %v763_v37  ;;  %v3052_v46 = vpack.c.bf16 %v971_v42, %v967_v41  ;;  %v969_v29 = vld [vmem:[#allocation5 + $0x1d0] sm:$0xff] }
 0x1ce   : > { %v973_v30 = vld [vmem:[#allocation5 + $0x1f0] sm:$0xff] }
 0x1cf   : > { %3001 = vmatpush1.bf16.msra.mxu0 %v3000_v48  ;;  %3033 = vmatpush1.bf16.msra.mxu1 %v3032_v49  ;;  %v913_v48 = vld [vmem:[#allocation5 + $0x10] sm:$0xff]  ;;  %v3084_v31 = vpack.c.bf16 %v973_v30, %v969_v29  ;;  %v1133_v29 = vlaneseq }
 0x1d0   : > { %3003 = vmatprep.subr.bf16.mxu0 %v3002_v52  ;;  %3035 = vmatprep.subr.bf16.mxu1 %v3034_v53  ;;  %v917_v49 = vld [vmem:[#allocation5 + $0x30] sm:$0xff]  ;;  %v3058_v53 = vpack.c.bf16 %v926_v51, %v922_v50 }
 0x1d1   : > { %v3056_v52 = vpack.c.bf16 %v917_v49, %v913_v48  ;;  %v3933_v30 = vshrl.u32 %v1133_v29, 7 }
 0x1d3   : > { %3005 = vmatpush1.bf16.msra.mxu0 %v3004_v61  ;;  %3037 = vmatpush1.bf16.msra.mxu1 %v3036_v62  ;;  %v929_v61 = vld [vmem:[#allocation5 + $0x90] sm:$0xff] }
 0x1d4   : > { %3007 = vmatprep.subr.bf16.mxu0 %v3006_v1  ;;  %3039 = vmatprep.subr.bf16.mxu1 %v3038_v2  ;;  %v933_v62 = vld [vmem:[#allocation5 + $0xb0] sm:$0xff]  ;;  %v3066_v2 = vpack.c.bf16 %v942_v0, %v938_v63 }
 0x1d5   : > { %v3064_v1 = vpack.c.bf16 %v933_v62, %v929_v61 }
 0x1d7   : > { %3009 = vmatpush1.bf16.msra.mxu0 %v3008_v11  ;;  %3041 = vmatpush1.bf16.msra.mxu1 %v3040_v12  ;;  %v945_v11 = vld [vmem:[#allocation5 + $0x110] sm:$0xff] }
 0x1d8   : > { %3011 = vmatprep.subr.bf16.mxu0 %v3010_v15  ;;  %3043 = vmatprep.subr.bf16.mxu1 %v3042_v16  ;;  %v949_v12 = vld [vmem:[#allocation5 + $0x130] sm:$0xff]  ;;  %v3074_v16 = vpack.c.bf16 %v958_v14, %v954_v13 }
 0x1d9   : > { %v3072_v15 = vpack.c.bf16 %v949_v12, %v945_v11 }
 0x1db   : > { %3013 = vmatpush1.bf16.msra.mxu0 %v3012_v23  ;;  %3045 = vmatpush1.bf16.msra.mxu1 %v3044_v24  ;;  %v961_v23 = vld [vmem:[#allocation5 + $0x190] sm:$0xff] }
 0x1dc   : > { %3015 = vmatprep.subr.bf16.mxu0 %v3014_v27  ;;  %3047 = vmatprep.subr.bf16.mxu1 %v3046_v28  ;;  %v965_v24 = vld [vmem:[#allocation5 + $0x1b0] sm:$0xff]  ;;  %v3082_v28 = vpack.c.bf16 %v974_v26, %v970_v25 }
 0x1dd   : > { %v3080_v27 = vpack.c.bf16 %v965_v24, %v961_v23 }
 0x1df   : > { %3017 = vmatpush1.bf16.msra.mxu0 %v3016_v35  ;;  %3049 = vmatpush1.bf16.msra.mxu1 %v3048_v36 }
 0x1e0   : > { %3019 = vmatprep.subr.bf16.mxu0 %v3018_v38  ;;  %3051 = vmatprep.subr.bf16.mxu1 %v3050_v39 }
 0x1e3   : > { %3021 = vmatpush1.bf16.msra.mxu0 %v3020_v45  ;;  %3053 = vmatpush1.bf16.msra.mxu1 %v3052_v46 }
 0x1e4   : > { %3055 = vmatprep.subr.bf16.mxu0 %v3054_v47  ;;  %2802 = vmatprep.subr.mxu1 %v3458_v57 }
 0x1e6   : > { %905 = vmatmul.mubr.f32.vlgmr.msra.gmra.mrb[4].mxu0 %v3812_v10  ;;  %1040 = vmatmul.mubr.f32.vlgmr.msra.gmra.mrb[4].mxu1 %v3812_v10 }
 0x1e7   : > { %3057 = vmatpush1.bf16.msra.mxu0 %v3056_v52  ;;  %1110 = vmatprep.mubr.f32.mxu0 %v3458_v57 }
 0x1e8   : > { %3059 = vmatprep.subr.bf16.mxu0 %v3058_v53  ;;  %2804 = vmatprep.mubr.msk.f32.mxu1 %vm3457_vm0, %v3458_v57 }
 0x1eb   : > { %3061 = vmatpush1.bf16.msra.mxu0 %v3060_v59 }
 0x1ec   : > { %3063 = vmatprep.subr.bf16.mxu0 %v3062_v60 }
 0x1ef   : > { %3065 = vmatpush1.bf16.msra.mxu0 %v3064_v1 }
 0x1f0   : > { %3067 = vmatprep.subr.bf16.mxu0 %v3066_v2 }
 0x1f3   : > { %3069 = vmatpush1.bf16.msra.mxu0 %v3068_v8 }
 0x1f4   : > { %3071 = vmatprep.subr.bf16.mxu0 %v3070_v9 }
 0x1f7   : > { %3073 = vmatpush1.bf16.msra.mxu0 %v3072_v15 }
 0x1f8   : > { %3075 = vmatprep.subr.bf16.mxu0 %v3074_v16 }
 0x1fb   : > { %3077 = vmatpush1.bf16.msra.mxu0 %v3076_v21 }
 0x1fc   : > { %3079 = vmatprep.subr.bf16.mxu0 %v3078_v22 }
 0x1ff   : > { %3081 = vmatpush1.bf16.msra.mxu0 %v3080_v27 }
 0x200   : > { %3083 = vmatprep.subr.bf16.mxu0 %v3082_v28 }
 0x203   : > { %3085 = vmatpush1.bf16.msra.mxu0 %v3084_v31  ;;  %v3935_v31 = vand.u32 127, %v1133_v29  ;;  %v1317_v29 = vld [vmem:[%s4148_s9 + $0x10] sm:$0xff] }
 0x204   : > { %3098 = vmatprep.subr.bf16.mxu0 %v3456_v4 }
 0x205   : > { %vm1228_vm3 = vcmp.gt.s32.totalorder %v3935_v31, %v3933_v30 }
 0x206   : > { %1111 = vmatmul.mubr.f32.vlgmr.msra.gmra.mrb[6].mxu0 %v3812_v10  ;;  %v3889_v10 = vld [vmem:[%s4140_s1] sm:$0xff] }
 0x207   : > { %2862 = vmatprep.mubr.msk.f32.mxu0 %vm3457_vm0, %v3458_v57 }
 0x279   : > { %v3879_v32 = vpop.f32.mrb[0].mxu0  ;;  %v615_v33 = vpop.f32.mrb[0].mxu1 }
 0x27a   : > { %1125 = vrot.lane.b32.xlu1 %v615_v33, %s3459_s25  ;;  %v2731_v34 = vpop.f32.mrb[1].mxu0  ;;  %v2766_v35 = vpop.f32.mrb[1].mxu1  ;;  %v3883_v36 = vsub.f32 0.0, %v3879_v32  ;;  %v1119_v37 = vsub.f32 0.0, %v615_v33  ;;  %v1130_v8 = vmul.f32 %v3889_v10, %v615_v33  ;;  %v1147_v20 = vmul.f32 %v3889_v10, %v3879_v32 }
 0x27c   : > { %1139 = vrot.lane.b32.xlu0 %v3883_v36, %s3460_s30 }
 0x27e   : > { %1121 = vrot.lane.b32.xlu1 %v1119_v37, %s3460_s30 }
 0x280   : > { %1327 = vrot.lane.b32.xlu0 %v3889_v10, %s3461_s19 }
 0x282   : > { %1143 = vrot.lane.b32.xlu1 %v3879_v32, %s3459_s25 }
 0x286   : > { %1322 = vrot.lane.b32.xlu1 %v3879_v32, %s3460_s30 }
 0x28a   : > { %1319 = vrot.lane.b32.xlu1 %v3883_v36, %s3462_s12 }
 0x299   : > { %v3898_v38 = vpop.f32.mrb[2].mxu0  ;;  %v835_v39 = vpop.f32.mrb[2].mxu1 }
 0x29a   : > { %v2801_v40 = vpop.f32.mrb[3].mxu0  ;;  %v837_v41 = vpop.f32.mrb[3].mxu1 }
 0x2b9   : > { %v906_v42 = vpop.f32.mrb[4].mxu0  ;;  %v1041_v43 = vpop.f32.mrb[4].mxu1 }
 0x2ba   : > { %v2532_v44 = vmul.f32 -1.442695, %v1041_v43  ;;  %v908_v45 = vpop.f32.mrb[5].mxu0  ;;  %v1043_v46 = vpop.f32.mrb[5].mxu1 }
 0x2bb   : > { %v2533_v47 = vmul.f32 -1.442695, %v1043_v46 }
 0x2bc   : > { %3260 = vpow2.f32 %v2532_v44 }
 0x2bd   : > { %3262 = vpow2.f32 %v2533_v47 }
 0x2c6   : > { %v3261_v48 = vpop.eup %3260 }
 0x2c7   : > { %v3263_v49 = vpop.eup %3262  ;;  %v2172_v50 = vadd.f32 1.0, %v3261_v48 }
 0x2c8   : > { %v2173_v51 = vadd.f32 1.0, %v3263_v49 }
 0x2c9   : > { %3264 = vrcp.f32 %v2172_v50 }
 0x2ca   : > { %3266 = vrcp.f32 %v2173_v51 }
 0x2d3   : > { %v3265_v52 = vpop.eup %3264 }
 0x2d4   : > { %v3267_v53 = vpop.eup %3266  ;;  %v2184_v54 = vmul.f32 %v3265_v52, %v1041_v43 }
 0x2d5   : > { %v2185_v55 = vmul.f32 %v3267_v53, %v1043_v46 }
 0x2d6   : > { %v3900_v56 = vmul.f32 %v2184_v54, %v835_v39 }
 0x2d7   : > { %v3902_v58 = vmul.f32 %v2185_v55, %v837_v41 }
 0x2d9   : > { %v1112_v59 = vpop.f32.mrb[6].mxu0 }
 0x2da   : > { %v2534_v60 = vmul.f32 -1.442695, %v1112_v59  ;;  %v1114_v61 = vpop.f32.mrb[7].mxu0 }
 0x2db   : > { %v2535_v62 = vmul.f32 -1.442695, %v1114_v61 }
 0x2dc   : > { %3268 = vpow2.f32 %v2534_v60 }
 0x2dd   : > { %3270 = vpow2.f32 %v2535_v62 }
 0x2e6   : > { %v3269_v63 = vpop.eup %3268 }
 0x2e7   : > { %v3271_v0 = vpop.eup %3270  ;;  %v2174_v1 = vadd.f32 1.0, %v3269_v63 }
 0x2e8   : > { %v2175_v2 = vadd.f32 1.0, %v3271_v0 }
 0x2e9   : > { %3272 = vrcp.f32 %v2174_v1 }
 0x2ea   : > { %3274 = vrcp.f32 %v2175_v2 }
 0x2ec   : > { %v1126_v3 = vpop.permute.xlu1 %1125 }
 0x2ee   : > { %v1140_v14 = vpop.permute.xlu0 %1139 }
 0x2f0   : > { %v1122_v6 = vpop.permute.xlu1 %1121 }
 0x2f1   : > { %v1129_v7 = vsel %vm1128_vm1, %v1122_v6, %v1126_v3 }
 0x2f2   : > { %v1131_v9 = vmul.f32 %v1129_v7, %v3907_v5  ;;  %v1328_v39 = vpop.permute.xlu0 %1327 }
 0x2f3   : > { %v3273_v11 = vpop.eup %3272  ;;  %v1330_v41 = vmul.f32 %v1328_v39, %v3879_v32 }
 0x2f4   : > { %v3275_v12 = vpop.eup %3274  ;;  %v2186_v13 = vmul.f32 %v3273_v11, %v1112_v59  ;;  %v3912_v15 = vadd.f32 %v1131_v9, %v1130_v8  ;;  %v1144_v16 = vpop.permute.xlu1 %1143  ;;  %v1498_v11 = vld [vmem:[%s4148_s9 + $0x20] sm:$0xff] }
 0x2f5   : > { %v2187_v17 = vmul.f32 %v3275_v12, %v1114_v61  ;;  %v1146_v18 = vsel %vm1128_vm1, %v1140_v14, %v1144_v16  ;;  %v1499_v12 = vld [vmem:[%s4148_s9 + $0x28] sm:$0xff]  ;;  %v1500_v16 = vld [vmem:[%s4148_s9 + $0x30] sm:$0xff] }
 0x2f6   : > { %v3915_v19 = vmul.f32 %v2186_v13, %v906_v42  ;;  %v1148_v21 = vmul.f32 %v1146_v18, %v3907_v5  ;;  %2803 = vmatpush3.xpose.msk.msra.mxu1 %vm1151_vm2, %v3912_v15 }
 0x2f7   : > { %v3922_v22 = vmul.f32 %v2187_v17, %v908_v45  ;;  %2807 = vmatprep.subr.mxu1 %v3458_v57  ;;  %v1501_v17 = vld [vmem:[%s4148_s9 + $0x38] sm:$0xff] }
 0x2f8   : > { %v1149_v23 = vadd.f32 %v1148_v21, %v1147_v20  ;;  %v1323_v24 = vpop.permute.xlu1 %1322  ;;  %v3090_v18 = vpack.c.bf16 %v1501_v17, %v1500_v16 }
 0x2fa   : > { %v1150_v25 = vmul.f32 0.17677669, %v1149_v23 }
 0x2fc   : > { %v1320_v26 = vpop.permute.xlu1 %1319  ;;  %2805 = vmatmul.mubr.msk.f32.vlgmr.msra.gmra.mrb[6].mxu1 %vm1151_vm2, %v1150_v25 }
 0x2fd   : > { %v1325_v27 = vsel %vm1128_vm1, %v1320_v26, %v1323_v24  ;;  %2808 = vmatpush3.msra.mxu1 %v3898_v38  ;;  %2809 = vmatprep.mubr.msk.f32.mxu1 %vm3457_vm0, %v3458_v57  ;;  %v1315_v26 = vld [vmem:[%s4148_s9] sm:$0xff] }
 0x2fe   : > { %v1331_v28 = vmul.f32 %v1325_v27, %v3907_v5  ;;  %2812 = vmatprep.subr.mxu1 %v3458_v57  ;;  %v1316_v27 = vld [vmem:[%s4148_s9 + $0x8] sm:$0xff] }
 0x300   : > { %1333 = vrot.lane.b32.xlu0 %v1331_v28, %s3461_s19  ;;  %v3093_v28 = vpack.c.bf16 %v1316_v27, %v1315_v26  ;;  %v2082_v26 = vld [vmem:[%s4148_s9 + $0x60] sm:$0xff]  ;;  %v2083_v27 = vld [vmem:[%s4148_s9 + $0x68] sm:$0xff] }
 0x372   : > { %v1334_v40 = vpop.permute.xlu0 %1333 }
 0x373   : > { %v1336_v42 = vadd.f32 %v1334_v40, %v1330_v41 }
 0x375   : > { %v1337_v43 = vmul.f32 0.17677669, %v1336_v42 }
 0x3cf   : > { %v1224_v33 = vpop.f32.mrb[6].mxu1 }
 0x3d0   : > { %v1229_v34 = vsel %vm1228_vm3, -3.4028235e+38, %v1224_v33  ;;  %v2806_v35 = vpop.f32.mrb[7].mxu1 }
 0x3d1   : > { %v1231_v37 = vsel %vm1230_vm4, %v1229_v34, -inf }
 0x3d2   : > { %1232 = vmax.xlane.f32.xlu1 %v1231_v37 }
 0x3e3   : > { %1339 = vrot.lane.b32.xlu1 %v1337_v43, %s3463_s26 }
 0x3e7   : > { %1648 = vrot.lane.b32.xlu1 %v3883_v36, %s3464_s11 }
 0x3eb   : > { %1655 = vrot.lane.b32.xlu1 %v3889_v10, %s3465_s23 }
 0x45f   : > { %v1233_v44 = vpop.xlane.xlu1 %1232 }
 0x460   : > { %v1234_v45 = vsub.f32 %v1229_v34, %v1233_v44 }
 0x462   : > { %v1235_v46 = vmul.f32 1.442695, %v1234_v45 }
 0x463   : > { %v1340_v52 = vpop.permute.xlu1 %1339 }
 0x464   : > { %3276 = vpow2.f32 %v1235_v46 }
 0x467   : > { %v1649_v6 = vpop.permute.xlu1 %1648 }
 0x46b   : > { %v1656_v20 = vpop.permute.xlu1 %1655 }
 0x46c   : > { %v1658_v21 = vmul.f32 %v1656_v20, %v3879_v32 }
 0x46e   : > { %v3277_v47 = vpop.eup %3276 }
 0x46f   : > { %v1237_v48 = vsel %vm1230_vm4, %v3277_v47, 0.0 }
 0x470   : > { %1238 = vadd.xlane.f32.xlu0 %v1237_v48 }
 0x4fd   : > { %v1239_v49 = vpop.xlane.xlu0 %1238 }
 0x4fe   : > { %3278 = vrcp.f32 %v1239_v49 }
 0x508   : > { %v3279_v50 = vpop.eup %3278 }
 0x509   : > { %v1241_v51 = vmul.f32 %v3279_v50, %v3277_v47 }
 0x50b   : > { %2810 = vmatmul.mubr.msk.f32.vlgmr.msra.gmra.mrb[8].mxu1 %vm1230_vm4, %v1241_v51 }
 0x50c   : > { %2813 = vmatpush3.xpose.msk.msra.mxu1 %vm1151_vm2, %v3912_v15  ;;  %2814 = vmatprep.mubr.msk.f32.mxu1 %vm3457_vm0, %v3458_v57 }
 0x50d   : > { %2817 = vmatprep.subr.mxu1 %v3458_v57 }
 0x50f   : > { %2815 = vmatmul.mubr.msk.f32.vlgmr.msra.gmra.mrb[10].mxu1 %vm1151_vm2, %v1340_v52 }
 0x510   : > { %2818 = vmatpush3.msra.mxu1 %v3898_v38  ;;  %2819 = vmatprep.mubr.msk.f32.mxu1 %vm3457_vm0, %v3458_v57 }
 0x511   : > { %3086 = vmatprep.subr.bf16.mxu1 %v3456_v4 }
 0x5de   : > { %v1311_v53 = vpop.f32.mrb[8].mxu1 }
 0x5df   : > { %v2811_v54 = vpop.f32.mrb[9].mxu1 }
 0x5e2   : > { %v1409_v55 = vpop.f32.mrb[10].mxu1 }
 0x5e3   : > { %v1413_v59 = vsel %vm1228_vm3, -3.4028235e+38, %v1409_v55  ;;  %v2816_v60 = vpop.f32.mrb[11].mxu1 }
 0x5e4   : > { %v1414_v61 = vsel %vm1230_vm4, %v1413_v59, -inf }
 0x5e5   : > { %1415 = vmax.xlane.f32.xlu0 %v1414_v61 }
 0x672   : > { %v1416_v62 = vpop.xlane.xlu0 %1415 }
 0x673   : > { %v1417_v63 = vsub.f32 %v1413_v59, %v1416_v62 }
 0x675   : > { %v1418_v0 = vmul.f32 1.442695, %v1417_v63 }
 0x677   : > { %3280 = vpow2.f32 %v1418_v0  ;;  %v1826_v0 = vld [vmem:[%s4148_s9 + $0x40] sm:$0xff] }
 0x681   : > { %v3281_v1 = vpop.eup %3280 }
 0x682   : > { %v1420_v2 = vsel %vm1230_vm4, %v3281_v1, 0.0 }
 0x683   : > { %1421 = vadd.xlane.f32.xlu0 %v1420_v2 }
 0x699   : > { %1651 = vrot.lane.b32.xlu0 %v3879_v32, %s3462_s12 }
 0x69d   : > { %1911 = vrot.lane.b32.xlu0 %v3889_v10, %s3463_s26  ;;  %v3087_v10 = vpack.c.bf16 %v1499_v12, %v1498_v11 }
 0x710   : > { %v1422_v3 = vpop.xlane.xlu0 %1421 }
 0x711   : > { %3282 = vrcp.f32 %v1422_v3  ;;  %v1829_v3 = vld [vmem:[%s4148_s9 + $0x58] sm:$0xff] }
 0x714   : > { %v1652_v7 = vpop.permute.xlu0 %1651 }
 0x715   : > { %v1654_v8 = vsel %vm1128_vm1, %v1649_v6, %v1652_v7 }
 0x716   : > { %v1659_v9 = vmul.f32 %v1654_v8, %v3907_v5 }
 0x718   : > { %1661 = vrot.lane.b32.xlu1 %v1659_v9, %s3465_s23  ;;  %v1912_v52 = vpop.permute.xlu0 %1911 }
 0x71b   : > { %v3283_v13 = vpop.eup %3282 }
 0x71c   : > { %v1424_v14 = vmul.f32 %v3283_v13, %v3281_v1  ;;  %v1828_v1 = vld [vmem:[%s4148_s9 + $0x50] sm:$0xff] }
 0x71d   : > { %v3102_v6 = vpack.c.bf16 %v1829_v3, %v1828_v1  ;;  %v2219_v1 = vld [vmem:[#allocation7 + $0xd8] sm:$0xff] }
 0x71e   : > { %2820 = vmatmul.mubr.msk.f32.vlgmr.msra.gmra.mrb[12].mxu1 %vm1230_vm4, %v1424_v14 }
 0x71f   : > { %3088 = vmatpush3.bf16.msra.mxu1 %v3087_v10  ;;  %2830 = vmatprep.mubr.msk.f32.mxu1 %vm3457_vm0, %v3458_v57 }
 0x720   : > { %3089 = vmatprep.subr.bf16.mxu1 %v3456_v4 }
 0x723   : > { %3091 = vmatpush3.bf16.msra.mxu1 %v3090_v18 }
 0x724   : > { %3092 = vmatprep.subr.bf16.mxu1 %v3456_v4 }
 0x78a   : > { %v1662_v23 = vpop.permute.xlu1 %1661 }
 0x78b   : > { %v1664_v24 = vadd.f32 %v1662_v23, %v1658_v21  ;;  %v2208_v23 = vld [vmem:[#allocation7 + $0x80] sm:$0xff] }
 0x78d   : > { %v1665_v25 = vmul.f32 0.17677669, %v1664_v24  ;;  %v2209_v24 = vld [vmem:[#allocation7 + $0x88] sm:$0xff] }
 0x78f   : > { %1667 = vrot.lane.b32.xlu1 %v1665_v25, %s3465_s23 }
 0x793   : > { %1904 = vrot.lane.b32.xlu1 %v3883_v36, %s3459_s25  ;;  %v1318_v36 = vld [vmem:[%s4148_s9 + $0x18] sm:$0xff]  ;;  %s419_s25 = sand.u32 1, %s3439_s18  }
 0x794   : > { %v3096_v35 = vpack.c.bf16 %v1318_v36, %v1317_v29  ;;  %v3105_v29 = vpack.c.bf16 %v2083_v27, %v2082_v26  ;;  %v2085_v36 = vld [vmem:[%s4148_s9 + $0x78] sm:$0xff]  ;;  %s2400_s15 = scalar_lea.sflag [#allocation4], %s419_s25 }
 0x795   : > { %v2243_v26 = vld [vmem:[#allocation7 + $0x198] sm:$0xff] }
 0x797   : > { %1907 = vrot.lane.b32.xlu1 %v3879_v32, %s3464_s11  ;;  %s2537_s11 = sshll.u32 %s3548_s21, 7  ;;  %s3466_s21 = smov [#allocation8]  }
 0x798   : > { %s4097_s12 = scalar_lea.hbm %s4178_s16, %s2537_s11 }
 0x7f1   : > { %v1494_v33 = vpop.f32.mrb[12].mxu1 }
 0x7f2   : > { %v2821_v34 = vpop.f32.mrb[13].mxu1  ;;  %2831 = vmatmul.mubr.msk.f32.vlgmr.msra.gmra.mrb[14].mxu1 %vm1151_vm2, %v1494_v33 }
 0x7f3   : > { %3094 = vmatpush3.bf16.msra.mxu1 %v3093_v28  ;;  %2841 = vmatprep.mubr.msk.f32.mxu1 %vm3457_vm0, %v3458_v57  ;;  %v2084_v28 = vld [vmem:[%s4148_s9 + $0x70] sm:$0xff] }
 0x7f4   : > { %3095 = vmatprep.subr.bf16.mxu1 %v3456_v4  ;;  %v3108_v33 = vpack.c.bf16 %v2085_v36, %v2084_v28  ;;  %v2227_v36 = vld [vmem:[#allocation7 + $0x118] sm:$0xff] }
 0x7f7   : > { %3097 = vmatpush3.bf16.msra.mxu1 %v3096_v35  ;;  %v2192_v35 = vld [vmem:[#allocation7] sm:$0xff] }
 0x7f8   : > { %2844 = vmatprep.subr.mxu1 %v3458_v57 }
 0x7fa   : > { %2842 = vmatmul.mubr.msk.f32.vlgmr.msra.gmra.mrb[16].mxu1 %vm1151_vm2, %v1311_v53 }
 0x7fb   : > { %2846 = vmatprep.mubr.msk.f32.mxu1 %vm3457_vm0, %v3458_v57 }
 0x800   : > { %2845 = vmatpush3.xpose.msk.msra.mxu1 %vm1151_vm2, %v3912_v15 }
 0x801   : > { %v1668_v37 = vpop.permute.xlu1 %1667  ;;  %2849 = vmatprep.subr.mxu1 %v3458_v57 }
 0x803   : > { %2847 = vmatmul.mubr.msk.f32.vlgmr.msra.gmra.mrb[18].mxu1 %vm1151_vm2, %v1668_v37  ;;  %v2193_v37 = vld [vmem:[#allocation7 + $0x8] sm:$0xff] }
 0x804   : > { %2850 = vmatpush3.msra.mxu1 %v3898_v38  ;;  %2851 = vmatprep.mubr.msk.f32.mxu1 %vm3457_vm0, %v3458_v57 }
 0x805   : > { %v1905_v39 = vpop.permute.xlu1 %1904  ;;  %2865 = vmatprep.subr.mxu1 %v3458_v57 }
 0x809   : > { %v1908_v40 = vpop.permute.xlu1 %1907 }
 0x80a   : > { %v1910_v41 = vsel %vm1128_vm1, %v1905_v39, %v1908_v40  ;;  %v2210_v39 = vld [vmem:[#allocation7 + $0x90] sm:$0xff]  ;;  %v2211_v40 = vld [vmem:[#allocation7 + $0x98] sm:$0xff] }
 0x80b   : > { %v1915_v42 = vmul.f32 %v1910_v41, %v3907_v5  ;;  %v1914_v5 = vmul.f32 %v1912_v52, %v3879_v32  ;;  %v1827_v32 = vld [vmem:[%s4148_s9 + $0x48] sm:$0xff]  ;;  %v2214_v52 = vld [vmem:[#allocation7 + $0xb0] sm:$0xff] }
 0x80c   : > { %v3099_v2 = vpack.c.bf16 %v1827_v32, %v1826_v0  ;;  %v2201_v0 = vld [vmem:[#allocation7 + $0x48] sm:$0xff]  ;;  %v2218_v32 = vld [vmem:[#allocation7 + $0xd0] sm:$0xff] }
 0x80d   : > { %1917 = vrot.lane.b32.xlu0 %v1915_v42, %s3463_s26  ;;  %v3112_v42 = vpack.c.bf16 %v2193_v37, %v2192_v35  ;;  %v3130_v3 = vpack.c.bf16 %v2219_v1, %v2218_v32  ;;  %v2245_v35 = vld [vmem:[#allocation7 + $0x1a8] sm:$0xff]  ;;  %v2254_v32 = vld [vmem:[#allocation7 + $0x1f0] sm:$0xff]  ;;  %v2255_v1 = vld [vmem:[#allocation7 + $0x1f8] sm:$0xff]  ;;  %s2513_s26 = sshll.u32 %s419_s25, 3 }
 0x80e   : > { %3100 = vmatpush3.bf16.msra.mxu0 %v3099_v2  ;;  %s421_s28 = scalar_lea.vmem [#allocation8], %s2513_s26 }
 0x80f   : > { %3101 = vmatprep.subr.bf16.mxu0 %v3456_v4  ;;  %s2413_s30 = sshll.u32 %s421_s28, 4  ;;  %s4099_s30 = int_to_ptr.vmem [resolvable:$true] %s2413_s30 }
 0x810   : > { %s3377_s24 = scalar_lea.vmem %s4099_s30, 128 }
 0x811   : > { %p3378_p12 = scmp.ne.s32.totalorder %s4099_s30, %s3377_s24 }
 0x812   : > { %3103 = vmatpush3.bf16.msra.mxu0 %v3102_v6  ;;  %v2202_v6 = vld [vmem:[#allocation7 + $0x50] sm:$0xff] }
 0x813   : > { %3104 = vmatprep.subr.bf16.mxu0 %v3456_v4  ;;  %p3379_p8 = pnand %p3378_p12, %p4179_p7 }
 0x815   : > { %p3380_p11 = pneg %p3379_p8 }
 0x87f   : > { %v1918_v53 = vpop.permute.xlu0 %1917 }
 0x880   : > { %v1920_v54 = vadd.f32 %v1918_v53, %v1914_v5  ;;  %v2215_v53 = vld [vmem:[#allocation7 + $0xb8] sm:$0xff] }
 0x882   : > { %v1921_v55 = vmul.f32 0.17677669, %v1920_v54  ;;  %v3122_v54 = vpack.c.bf16 %v2215_v53, %v2214_v52  ;;  %v2250_v52 = vld [vmem:[#allocation7 + $0x1d0] sm:$0xff]  ;;  %v2251_v53 = vld [vmem:[#allocation7 + $0x1d8] sm:$0xff] }
 0x8c5   : > { %v1571_v43 = vpop.f32.mrb[14].mxu1 }
 0x8c6   : > { %v2832_v44 = vpop.f32.mrb[15].mxu1 }
 0x8c7   : > { %v3114_v44 = vpack.c.bf16 %v2211_v40, %v2210_v39  ;;  %v2228_v40 = vld [vmem:[#allocation7 + $0x120] sm:$0xff] }
 0x8cd   : > { %v1644_v45 = vpop.f32.mrb[16].mxu1 }
 0x8ce   : > { %v4027_v46 = vadd.f32 %v1644_v45, %v1571_v43  ;;  %v2843_v47 = vpop.f32.mrb[17].mxu1  ;;  %v2194_v45 = vld [vmem:[#allocation7 + $0x10] sm:$0xff] }
 0x8cf   : > { %v2212_v47 = vld [vmem:[#allocation7 + $0xa0] sm:$0xff] }
 0x8d6   : > { %v1737_v48 = vpop.f32.mrb[18].mxu1 }
 0x8d7   : > { %v1741_v49 = vsel %vm1228_vm3, -3.4028235e+38, %v1737_v48  ;;  %v2848_v50 = vpop.f32.mrb[19].mxu1  ;;  %v2213_v48 = vld [vmem:[#allocation7 + $0xa8] sm:$0xff] }
 0x8d8   : > { %v1742_v51 = vsel %vm1230_vm4, %v1741_v49, -inf  ;;  %v2196_v50 = vld [vmem:[#allocation7 + $0x20] sm:$0xff] }
 0x8d9   : > { %1743 = vmax.xlane.f32.xlu1 %v1742_v51  ;;  %v2197_v51 = vld [vmem:[#allocation7 + $0x28] sm:$0xff] }
 0x8da   : > { %v3120_v5 = vpack.c.bf16 %v2197_v51, %v2196_v50  ;;  %v2233_v51 = vld [vmem:[#allocation7 + $0x148] sm:$0xff] }
 0x8ea   : > { %1923 = vrot.lane.b32.xlu1 %v1921_v55, %s3461_s19  ;;  %v2198_v55 = vld [vmem:[#allocation7 + $0x30] sm:$0xff] }
 0x966   : > { %v1744_v59 = vpop.xlane.xlu1 %1743 }
 0x967   : > { %v1745_v60 = vsub.f32 %v1741_v49, %v1744_v59  ;;  %v3118_v49 = vpack.c.bf16 %v2213_v48, %v2212_v47  ;;  %v2199_v59 = vld [vmem:[#allocation7 + $0x38] sm:$0xff]  ;;  %v2248_v48 = vld [vmem:[#allocation7 + $0x1c0] sm:$0xff] }
 0x968   : > { %v2231_v47 = vld [vmem:[#allocation7 + $0x138] sm:$0xff] }
 0x969   : > { %v1746_v61 = vmul.f32 1.442695, %v1745_v60  ;;  %v2216_v60 = vld [vmem:[#allocation7 + $0xc0] sm:$0xff] }
 0x96a   : > { %v1924_v11 = vpop.permute.xlu1 %1923 }
 0x96b   : > { %3284 = vpow2.f32 %v1746_v61  ;;  %v2217_v61 = vld [vmem:[#allocation7 + $0xc8] sm:$0xff] }
 0x975   : > { %v3285_v62 = vpop.eup %3284 }
 0x976   : > { %v1748_v63 = vsel %vm1230_vm4, %v3285_v62, 0.0 }
 0x977   : > { %1749 = vadd.xlane.f32.xlu0 %v1748_v63  ;;  %v3126_v63 = vpack.c.bf16 %v2217_v61, %v2216_v60  ;;  %v2252_v60 = vld [vmem:[#allocation7 + $0x1e0] sm:$0xff]  ;;  %v2253_v61 = vld [vmem:[#allocation7 + $0x1e8] sm:$0xff] }
 0xa04   : > { %v1750_v7 = vpop.xlane.xlu0 %1749 }
 0xa05   : > { %3286 = vrcp.f32 %v1750_v7  ;;  %v2203_v7 = vld [vmem:[#allocation7 + $0x58] sm:$0xff] }
 0xa0f   : > { %v3287_v8 = vpop.eup %3286 }
 0xa10   : > { %v1752_v9 = vmul.f32 %v3287_v8, %v3285_v62  ;;  %v3124_v62 = vpack.c.bf16 %v2199_v59, %v2198_v55  ;;  %v2220_v8 = vld [vmem:[#allocation7 + $0xe0] sm:$0xff]  ;;  %v2234_v55 = vld [vmem:[#allocation7 + $0x150] sm:$0xff]  ;;  %v2235_v59 = vld [vmem:[#allocation7 + $0x158] sm:$0xff] }
 0xa12   : > { %2852 = vmatmul.mubr.msk.f32.vlgmr.msra.gmra.mrb[20].mxu1 %vm1230_vm4, %v1752_v9  ;;  %v2221_v9 = vld [vmem:[#allocation7 + $0xe8] sm:$0xff] }
 0xa13   : > { %2866 = vmatpush3.xpose.msk.msra.mxu1 %vm1151_vm2, %v3912_v15  ;;  %2867 = vmatprep.mubr.msk.f32.mxu1 %vm3457_vm0, %v3458_v57 }
 0xa14   : > { %2870 = vmatprep.subr.mxu1 %v3458_v57 }
 0xa16   : > { %2868 = vmatmul.mubr.msk.f32.vlgmr.msra.gmra.mrb[22].mxu1 %vm1151_vm2, %v1924_v11  ;;  %v3132_v11 = vpack.c.bf16 %v2203_v7, %v2202_v6  ;;  %v2238_v6 = vld [vmem:[#allocation7 + $0x170] sm:$0xff]  ;;  %v2239_v7 = vld [vmem:[#allocation7 + $0x178] sm:$0xff] }
 0xa17   : > { %2871 = vmatpush3.msra.mxu1 %v3898_v38  ;;  %2872 = vmatprep.mubr.msk.f32.mxu1 %vm3457_vm0, %v3458_v57 }
 0xae5   : > { %v1822_v12 = vpop.f32.mrb[20].mxu1 }
 0xae6   : > { %v2853_v13 = vpop.f32.mrb[21].mxu1  ;;  %2863 = vmatmul.mubr.msk.f32.vlgmr.msra.gmra.mrb[8].mxu0 %vm1151_vm2, %v1822_v12  ;;  %v3134_v12 = vpack.c.bf16 %v2221_v9, %v2220_v8  ;;  %v3172_v8 = vpack.c.bf16 %v2239_v7, %v2238_v6 }
 0xae7   : > { %2883 = vmatprep.mubr.msk.f32.mxu0 %vm3457_vm0, %v3458_v57  ;;  %v3110_v57 = vpack.c.bf16 %v2209_v24, %v2208_v23  ;;  %3106 = vmatpush3.bf16.msra.mxu0 %v3105_v29  ;;  %v2204_v13 = vld [vmem:[#allocation7 + $0x60] sm:$0xff]  ;;  %v2241_v23 = vld [vmem:[#allocation7 + $0x188] sm:$0xff]  ;;  %v2226_v29 = vld [vmem:[#allocation7 + $0x110] sm:$0xff] }
 0xae8   : > { %3107 = vmatprep.subr.bf16.mxu0 %v3456_v4 }
 0xae9   : > { %v1993_v15 = vpop.f32.mrb[22].mxu1  ;;  %3111 = vmatprep.subr.bf16.mxu1 %v3110_v57  ;;  %v2224_v57 = vld [vmem:[#allocation7 + $0x100] sm:$0xff] }
 0xaea   : > { %v1997_v10 = vsel %vm1228_vm3, -3.4028235e+38, %v1993_v15  ;;  %v2869_v14 = vpop.f32.mrb[23].mxu1  ;;  %v2205_v15 = vld [vmem:[#allocation7 + $0x68] sm:$0xff] }
 0xaeb   : > { %v1998_v16 = vsel %vm1230_vm4, %v1997_v10, -inf  ;;  %3109 = vmatpush3.bf16.msra.mxu0 %v3108_v33  ;;  %v2223_v14 = vld [vmem:[#allocation7 + $0xf8] sm:$0xff] }
 0xaec   : > { %1999 = vmax.xlane.f32.xlu0 %v1998_v16  ;;  %v3136_v16 = vpack.c.bf16 %v2205_v15, %v2204_v13 }
 0xb79   : > { %v2000_v38 = vpop.xlane.xlu0 %1999 }
 0xb7a   : > { %v2001_v17 = vsub.f32 %v1997_v10, %v2000_v38  ;;  %v2222_v10 = vld [vmem:[#allocation7 + $0xf0] sm:$0xff] }
 0xb7b   : > { %v3138_v38 = vpack.c.bf16 %v2223_v14, %v2222_v10 }
 0xb7c   : > { %v2002_v18 = vmul.f32 1.442695, %v2001_v17  ;;  %v2206_v17 = vld [vmem:[#allocation7 + $0x70] sm:$0xff] }
 0xb7e   : > { %3288 = vpow2.f32 %v2002_v18  ;;  %v2207_v18 = vld [vmem:[#allocation7 + $0x78] sm:$0xff] }
 0xb88   : > { %v3289_v20 = vpop.eup %3288 }
 0xb89   : > { %v2004_v21 = vsel %vm1230_vm4, %v3289_v20, 0.0 }
 0xb8a   : > { %2005 = vadd.xlane.f32.xlu0 %v2004_v21  ;;  %v2240_v21 = vld [vmem:[#allocation7 + $0x180] sm:$0xff] }
 0xb8b   : > { %v3142_v24 = vpack.c.bf16 %v2241_v23, %v2240_v21 }
 0xb8d   : > { %3143 = vmatprep.subr.bf16.mxu0 %v3142_v24 }
 0xbb9   : > { %v1899_v25 = vpop.f32.mrb[8].mxu0 }
 0xbba   : > { %v4069_v30 = vadd.f32 %v1899_v25, %v4027_v46  ;;  %v2864_v31 = vpop.f32.mrb[9].mxu0  ;;  %v2195_v46 = vld [vmem:[#allocation7 + $0x18] sm:$0xff]  ;;  %v2225_v25 = vld [vmem:[#allocation7 + $0x108] sm:$0xff] }
 0xbbb   : > { %v3116_v4 = vpack.c.bf16 %v2195_v46, %v2194_v45  ;;  %v2242_v31 = vld [vmem:[#allocation7 + $0x190] sm:$0xff]  ;;  %v3144_v27 = vpack.c.bf16 %v2225_v25, %v2224_v57 }
 0xbbc   : > { %v3146_v28 = vpack.c.bf16 %v2243_v26, %v2242_v31  ;;  %v2230_v46 = vld [vmem:[#allocation7 + $0x130] sm:$0xff] }
 0xc17   : > { %v2006_v34 = vpop.xlane.xlu0 %2005 }
 0xc18   : > { %3290 = vrcp.f32 %v2006_v34  ;;  %v2244_v34 = vld [vmem:[#allocation7 + $0x1a0] sm:$0xff] }
 0xc19   : > { %v3150_v39 = vpack.c.bf16 %v2245_v35, %v2244_v34 }
 0xc22   : > { %v3291_v41 = vpop.eup %3290 }
 0xc23   : > { %v2008_v43 = vmul.f32 %v3291_v41, %v3289_v20  ;;  %v3140_v20 = vpack.c.bf16 %v2207_v18, %v2206_v17  ;;  %v2229_v41 = vld [vmem:[#allocation7 + $0x128] sm:$0xff] }
 0xc25   : > { %2873 = vmatmul.mubr.msk.f32.vlgmr.msra.gmra.mrb[24].mxu1 %vm1230_vm4, %v2008_v43  ;;  %v2247_v43 = vld [vmem:[#allocation7 + $0x1b8] sm:$0xff] }
 0xc26   : > { %3113 = vmatpush3.bf16.msra.mxu1 %v3112_v42  ;;  %2320 = vmatprep.mubr.f32.mxu1 %v3902_v58  ;;  %v2200_v58 = vld [vmem:[#allocation7 + $0x40] sm:$0xff]  ;;  %v2246_v42 = vld [vmem:[#allocation7 + $0x1b0] sm:$0xff] }
 0xc27   : > { %3115 = vmatprep.subr.bf16.mxu1 %v3114_v44  ;;  %v3128_v2 = vpack.c.bf16 %v2201_v0, %v2200_v58  ;;  %v3152_v44 = vpack.c.bf16 %v2229_v41, %v2228_v40  ;;  %v3154_v45 = vpack.c.bf16 %v2247_v43, %v2246_v42  ;;  %v2236_v58 = vld [vmem:[#allocation7 + $0x160] sm:$0xff]  ;;  %v2237_v0 = vld [vmem:[#allocation7 + $0x168] sm:$0xff] }
 0xc2a   : > { %3117 = vmatpush3.bf16.msra.mxu1 %v3116_v4  ;;  %v2249_v4 = vld [vmem:[#allocation7 + $0x1c8] sm:$0xff] }
 0xc2b   : > { %3119 = vmatprep.subr.bf16.mxu1 %v3118_v49  ;;  %v3156_v49 = vpack.c.bf16 %v2231_v47, %v2230_v46  ;;  %v3158_v50 = vpack.c.bf16 %v2249_v4, %v2248_v48 }
 0xc2e   : > { %3121 = vmatpush3.bf16.msra.mxu1 %v3120_v5 }
 0xc2f   : > { %3123 = vmatprep.subr.bf16.mxu1 %v3122_v54  ;;  %v3162_v54 = vpack.c.bf16 %v2251_v53, %v2250_v52 }
 0xc32   : > { %3125 = vmatpush3.bf16.msra.mxu1 %v3124_v62  ;;  %v3164_v62 = vpack.c.bf16 %v2235_v59, %v2234_v55 }
 0xc33   : > { %3127 = vmatprep.subr.bf16.mxu1 %v3126_v63  ;;  %v3166_v63 = vpack.c.bf16 %v2253_v61, %v2252_v60 }
 0xc36   : > { %3129 = vmatpush3.bf16.msra.mxu1 %v3128_v2  ;;  %v3168_v2 = vpack.c.bf16 %v2237_v0, %v2236_v58 }
 0xc37   : > { %3131 = vmatprep.subr.bf16.mxu1 %v3130_v3  ;;  %v3170_v3 = vpack.c.bf16 %v2255_v1, %v2254_v32 }
 0xc3a   : > { %3133 = vmatpush3.bf16.msra.mxu1 %v3132_v11 }
 0xc3b   : > { %3135 = vmatprep.subr.bf16.mxu1 %v3134_v12 }
 0xc3e   : > { %3137 = vmatpush3.bf16.msra.mxu1 %v3136_v16 }
 0xc3f   : > { %3139 = vmatprep.subr.bf16.mxu1 %v3138_v38 }
 0xc42   : > { %3141 = vmatpush3.bf16.msra.mxu1 %v3140_v20  ;;  %v3292_v20 = vld [vmem:[%s3680_s17] sm:$0xff]  ;;  %s3381_s17 = sshll.u32 %s3466_s21, 4  ;;  %s3382_s17 = int_to_ptr.vmem [resolvable:$false] %s3381_s17 }
 0xc43   : > { %s3383_s13 = scalar_lea.vmem %s3382_s17, 256  ;;  %p3384_p13 = scmp.lt.s32.totalorder %s4099_s30, %s3382_s17 }
 0xc44   : > { %p3385_p1 = scmp.lt.s32.totalorder %s3383_s13, %s3377_s24 }
 0xc45   : > { %2321 = vmatmul.mubr.f32.vlgmr.msra.gmra.mrb[26].mxu1 %v3900_v56  ;;  %v3148_v56 = vpack.c.bf16 %v2227_v36, %v2226_v29 }
 0xc46   : > { %p3386_p6 = por %p3385_p1, %p3384_p13 }
 0xc48   : > { %p3387_p9 = pnand %p3386_p6, %p3380_p11 }
 0xcf8   : > { %v2078_v33 = vpop.f32.mrb[24].mxu1 }
 0xcf9   : > { %v2874_v37 = vpop.f32.mrb[25].mxu1  ;;  %2884 = vmatmul.mubr.msk.f32.vlgmr.msra.gmra.mrb[10].mxu0 %vm1151_vm2, %v2078_v33 }
 0xcfa   : > { %3145 = vmatpush3.bf16.msra.mxu0 %v3144_v27  ;;  %2390 = vmatprep.mubr.f32.mxu0 %v3922_v22  ;;  %v2232_v22 = vld [vmem:[#allocation7 + $0x140] sm:$0xff] }
 0xcfb   : > { %3147 = vmatprep.subr.bf16.mxu0 %v3146_v28  ;;  %v3160_v5 = vpack.c.bf16 %v2233_v51, %v2232_v22 }
 0xcfe   : > { %3149 = vmatpush3.bf16.msra.mxu0 %v3148_v56 }
 0xcff   : > { %3151 = vmatprep.subr.bf16.mxu0 %v3150_v39 }
 0xd02   : > { %3153 = vmatpush3.bf16.msra.mxu0 %v3152_v44 }
 0xd03   : > { %3155 = vmatprep.subr.bf16.mxu0 %v3154_v45 }
 0xd06   : > { %3157 = vmatpush3.bf16.msra.mxu0 %v3156_v49 }
 0xd07   : > { %3159 = vmatprep.subr.bf16.mxu0 %v3158_v50 }
 0xd0a   : > { %3161 = vmatpush3.bf16.msra.mxu0 %v3160_v5 }
 0xd0b   : > { %3163 = vmatprep.subr.bf16.mxu0 %v3162_v54 }
 0xd0e   : > { %3165 = vmatpush3.bf16.msra.mxu0 %v3164_v62 }
 0xd0f   : > { %3167 = vmatprep.subr.bf16.mxu0 %v3166_v63 }
 0xd12   : > { %3169 = vmatpush3.bf16.msra.mxu0 %v3168_v2 }
 0xd13   : > { %3171 = vmatprep.subr.bf16.mxu0 %v3170_v3 }
 0xd16   : > { %3173 = vmatpush3.bf16.msra.mxu0 %v3172_v8 }
 0xd18   : > { %v2659_v9 = vpop.f32.mrb[26].mxu1 }
 0xd19   : > { %v2660_v11 = vpop.f32.mrb[27].mxu1  ;;  %2391 = vmatmul.mubr.f32.vlgmr.msra.gmra.mrb[12].mxu0 %v3915_v19 }
 0xd1a   : > { %v2661_v12 = vadd.f32 %v2660_v11, %v2659_v9 }
 0xdcc   : > { %v2155_v13 = vpop.f32.mrb[10].mxu0 }
 0xdcd   : > { %v2159_v15 = vadd.f32 %v2155_v13, %v4069_v30  ;;  %v2885_v10 = vpop.f32.mrb[11].mxu0 }
 0xdec   : > { %v2694_v14 = vpop.f32.mrb[12].mxu0 }
 0xded   : > { %v2695_v16 = vpop.f32.mrb[13].mxu0 }
 0xdee   : > { %v2696_v38 = vadd.f32 %v2695_v16, %v2694_v14 }
 0xdf0   : > { %v2393_v17 = vadd.f32 %v2696_v38, %v2661_v12 }
 0xdf2   : > { %v2396_v18 = vadd.f32 %v2393_v17, %v2159_v15 }
 0xdf4   : > { %v2397_v21 = vadd.f32 %v3292_v20, %v2396_v18 }
 0xdf6   : > { %2398 = vst [vmem:[%s421_s28] sm:$0xff] %v2397_v21 }
 0xdf7   : > { %3390 = shalt.err (!%p3387_p9)
}
 0xdf8   : > { %s3391_s22 = scalar_lea.hbm %s4097_s12, 128  ;;  %s3395_s20 = scalar_lea.hbm %s4178_s16, 256 }
 0xdf9   : > { %p3392_p2 = scmp.ne.s32.totalorder %s4097_s12, %s3391_s22  ;;  %p3396_p5 = scmp.lt.u32.totalorder %s4097_s12, %s4178_s16 }
 0xdfa   : > { %p3397_p10 = scmp.lt.u32.totalorder %s3395_s20, %s3391_s22  ;;  %p3399_p12 = scmp.lt.u32.totalorder %s3391_s22, %s4097_s12 }
 0xdfb   : > { %p3393_p3 = pnand %p3392_p2, %p4179_p7 }
 0xdfc   : > { %p3398_p4 = por %p3397_p10, %p3396_p5 }
 0xdfd   : > { %p3394_p0 = pneg %p3393_p3 }
 0xdfe   : > { %p3400_p8 = por %p3399_p12, %p3398_p4 }
 0xe00   : > { %p3401_p11 = pnand %p3400_p8, %p3394_p0 }
 0xe02   : > { %3404 = shalt.err (!%p3401_p11)
}
 0xe03   : > { %3186 = dma.vmem_to_hbm [thread:$0]  (%p4179_p7), %s4099_s30, 128, %s4097_s12, %s2400_s15  }
 0xe04 PF: > { %s4180_s11 = sld [smem:[#allocation14_spill]]  ;;  %s4181_s28 = sld [smem:[#allocation12_spill]] }
 0xe05   : > { %s4182_s14 = sld [smem:[#allocation17_spill]] }
 0xe0a   : > { %p3208_p13 = scmp.ge.s32.totalorder %s4180_s11, 2  ;;  %s2425_s19 = sand.u32 1, %s4181_s28  }
 0xe0b   : > { %p4183_p1 = scmp.ne.s32.totalorder %s4182_s14, 0  ;;  %s2426_s24 = scalar_lea.sflag [#allocation4], %s2425_s19 }
 0xe0d   : > { %p3199_p6 = pnand %p3208_p13, %p4183_p1 }
 0xe0f   : > { %3430 = dma.done.wait (!%p3199_p6), %s2426_s24, 128  }
 0xe10   : > { %3432 = vsyncadd (!%p3199_p6), %s2426_s24, 4294967168  ;;  %s4184_s20 = sld [smem:[#allocation15_spill]]  ;;  %s4185_s21 = sld [smem:[#allocation13_spill]] }
 0xe11   : > { %s4186_s19 = sld [smem:[#allocation16_spill]]  ;;  %s4187_s17 = smov %s3439_s18 }
 0xe16   : > { %p23_p9 = scmp.ge.s32.totalorder %s4184_s20, 4   ;;  %s4188_s18 = smov %s4185_s21 }
 0xe18   :  { %25 = sbr.rel (!%p23_p9) target bundleno = 7 (0x7), region = 112 }
 0xe1f   :  { %2431 = vsyncpa [#allocation3], 1 }
 0xe20   :  { %2433 = vsyncpa [#allocation3 + $0x1], 1 }
 0xe21   :  { %2434 = vsyncpa [#allocation6], 1 }
 0xe22   :  { %2435 = vsyncpa [#allocation4], 1 }
 0xe23   :  { %2437 = vsyncpa [#allocation4 + $0x1], 1 }

</bundles_post_ra>
